<compile_context>
chip_gen: v5e
topology: v5e:2x2
jax: 0.10.0
libtpu: 0.0.40
codegen_flags: <defaults>
</compile_context>

<pallas_src>
import functools

import jax
import jax.numpy as jnp
import numpy as np
from jax.experimental import pallas as pl
from jax.experimental.pallas import tpu as pltpu

# ----- block configuration (BlockArgs / GlobalParams) -----
INPUT_FILTERS = 8
OUTPUT_FILTERS = 8
EXPAND_RATIO = 4
KERNEL_SIZE = 3
STRIDE = 1
SE_RATIO = 0.25
ID_SKIP = True
BN_EPS = 1e-3  # EfficientNet default batch_norm_epsilon

OUP = INPUT_FILTERS * EXPAND_RATIO                      # 32 expanded channels
NUM_SQUEEZED = max(1, int(INPUT_FILTERS * SE_RATIO))    # 2
NUM_TAPS = KERNEL_SIZE * KERNEL_SIZE                    # 9

# packed per-channel parameter table: rows = expanded channel, columns as below
_C_BN0_B = 0                                  # BN0 shift (BN0 scale folded into expand weight)
_C_BN1_B = 1                                  # BN1 shift (BN1 scale folded into dw taps)
_C_BN2_B = 2                                  # BN2 shift, rows 0:Cout (scale folded into project)
_C_SE_E_B = 3                                 # SE expand bias
_C_DW = 4                                     # cols 4..12  : depthwise taps (BN1 scale folded in)
_C_SE_R_W = _C_DW + NUM_TAPS                  # cols 13..14 : SE reduce weight  [Cexp, NSQ]
_C_SE_E_W = _C_SE_R_W + NUM_SQUEEZED          # cols 15..16 : SE expand weight^T [Cexp, NSQ]
_C_SE_R_B = _C_SE_E_W + NUM_SQUEEZED          # cols 17..18 : SE reduce bias (broadcast down rows)
CP_COLS = _C_SE_R_B + NUM_SQUEEZED            # 19


def _swish(x):
    return x * jax.nn.sigmoid(x)


def _is_pow2(n):
    return n > 0 and (n & (n - 1)) == 0


# -------------------- fused Pallas kernel (B_blk images per grid step) --------------------

def mbconv_kernel(x_ref, we_ref, wp_ref, cp_ref, o_ref, *, H, W, nimg):
    """Whole MBConv block for `nimg` images laid out along lanes.

    x_ref  : [Cin,  nimg*HW]  f32   (channels on sublanes, flattened spatial on lanes)
    we_ref : [Cexp, Cin]      bf16  expand 1x1 weight (BN0 scale folded into rows)
    wp_ref : [Cout, Cexp]     bf16  project 1x1 weight (BN2 scale folded into rows)
    cp_ref : [Cexp, CP_COLS]  f32   packed per-channel params (BN shifts, dw taps, SE)
    o_ref  : [Cout, nimg*HW]  f32
    """
    HW = H * W
    lhw = x_ref.shape[-1]
    x = x_ref[...]                                                   # [Cin, lhw]
    cp = cp_ref[...]                                                 # [Cexp, CP_COLS]

    # per-lane (h, w, image) indices for the depthwise boundary masks / SE segmentation
    flat = jax.lax.broadcasted_iota(jnp.int32, (1, lhw), 1)
    if _is_pow2(W) and _is_pow2(HW):
        w_idx = jnp.bitwise_and(flat, W - 1)
        h_idx = jnp.right_shift(jnp.bitwise_and(flat, HW - 1), (W - 1).bit_length())
    else:
        w_idx = flat % W
        h_idx = (flat % HW) // W

    # ---- 1x1 expand conv (MXU, bf16 operands, f32 acc) + BN0 shift + swish ----
    e = jnp.dot(we_ref[...], x.astype(jnp.bfloat16),
                preferred_element_type=jnp.float32)                  # [Cexp, lhw]
    e = _swish(e + cp[:, _C_BN0_B:_C_BN0_B + 1])

    # ---- 3x3 SAME depthwise conv (stride 1): lane rolls (XLU) + boundary masks (VPU) ----
    p = KERNEL_SIZE // 2
    acc = None
    for kh in range(KERNEL_SIZE):
        for kw in range(KERNEL_SIZE):
            t = kh * KERNEL_SIZE + kw
            dh, dw = kh - p, kw - p
            s = dh * W + dw
            shifted = e if s == 0 else pltpu.roll(e, (-s) % lhw, 1)  # shifted[i] = e[i + s]
            tap = cp[:, _C_DW + t:_C_DW + t + 1]                     # [Cexp, 1] (BN1 scale folded)
            if dh == 0 and dw == 0:
                term = shifted * tap
            else:
                valid = None
                conds = []
                if dh > 0:
                    conds.append(h_idx < H - dh)
                if dh < 0:
                    conds.append(h_idx >= -dh)
                if dw > 0:
                    conds.append(w_idx < W - dw)
                if dw < 0:
                    conds.append(w_idx >= -dw)
                for c in conds:
                    valid = c if valid is None else jnp.logical_and(valid, c)
                term = shifted * tap * valid.astype(jnp.float32)     # zero-padded taps
            acc = term if acc is None else acc + term
    y = _swish(acc + cp[:, _C_BN1_B:_C_BN1_B + 1])                   # [Cexp, lhw]

    # ---- squeeze & excitation (per-image lane pooling -> tiny dense -> lane-broadcast gate) ----
    inv_hw = 1.0 / float(HW)
    if nimg > 1:
        if _is_pow2(HW):
            img_id = jnp.right_shift(flat, (HW - 1).bit_length())
        else:
            img_id = flat // HW
        img_masks = [(img_id == b).astype(jnp.float32) for b in range(nimg)]   # each [1, lhw]
        pooled_all = [jnp.sum(y * m, axis=1, keepdims=True) * inv_hw for m in img_masks]
    else:
        img_masks = [None]
        pooled_all = [jnp.sum(y, axis=1, keepdims=True) * inv_hw]

    gate_full = None
    for b in range(nimg):
        pooled = pooled_all[b]                                       # [Cexp, 1]
        ex = cp[:, _C_SE_E_B:_C_SE_E_B + 1]                          # [Cexp, 1]  (SE expand bias)
        for n_ in range(NUM_SQUEEZED):
            s_n = jnp.sum(cp[:, _C_SE_R_W + n_:_C_SE_R_W + n_ + 1] * pooled,
                          axis=0, keepdims=True)                     # [1, 1]
            s_n = _swish(s_n + cp[0:1, _C_SE_R_B + n_:_C_SE_R_B + n_ + 1])
            ex = ex + cp[:, _C_SE_E_W + n_:_C_SE_E_W + n_ + 1] * s_n
        gate_b = jax.nn.sigmoid(ex)                                  # [Cexp, 1]
        if nimg == 1:
            gate_full = gate_b
        else:
            contrib = gate_b * img_masks[b]                          # [Cexp, lhw]
            gate_full = contrib if gate_full is None else gate_full + contrib
    y = y * gate_full

    # ---- 1x1 project conv (MXU, bf16 operands) + BN2 shift + identity skip ----
    out = jnp.dot(wp_ref[...], y.astype(jnp.bfloat16),
                  preferred_element_type=jnp.float32)                # [Cout, lhw]
    out = out + cp[:OUTPUT_FILTERS, _C_BN2_B:_C_BN2_B + 1]
    if ID_SKIP and STRIDE == 1 and INPUT_FILTERS == OUTPUT_FILTERS:
        out = out + x
    o_ref[...] = out


# -------------------- wrapper --------------------

def _choose_images_per_step(n):
    """Largest divisor of n that still leaves >= 2 grid steps (keeps both v7x TCs busy)."""
    if n <= 1:
        return 1
    for b in range(n // 2, 0, -1):
        if n % b == 0:
            return b
    return 1


def _pack_channel_params(params):
    """Pack all per-channel scalars into one [Cexp, CP_COLS] table (prep-time plumbing)."""
    def col(v, rows=OUP):
        v = jnp.asarray(v, jnp.float32).reshape(-1)
        if v.shape[0] < rows:
            v = jnp.pad(v, (0, rows - v.shape[0]))
        return v.reshape(rows, 1)

    # depthwise taps with BN1 scale folded in: [Cexp, 9], column t = tap kh*K+kw
    dw = (params["dw_w"].reshape(NUM_TAPS, OUP)
          * params["bn1_scale"].reshape(1, OUP)).T
    se_r_b_bcast = jnp.broadcast_to(params["se_r_b"].reshape(1, NUM_SQUEEZED),
                                    (OUP, NUM_SQUEEZED))

    cols = [
        col(params["bn0_shift"]),          # 0
        col(params["bn1_shift"]),          # 1
        col(params["bn2_shift"]),          # 2 (Cout rows, zero padded)
        col(params["se_e_b"]),             # 3
        dw,                                # 4..12
        params["se_r_w"],                  # 13..14  [Cexp, NSQ]
        params["se_e_w"].T,                # 15..16  [Cexp, NSQ]
        se_r_b_bcast,                      # 17..18  (scalar bias broadcast down rows)
    ]
    return jnp.concatenate(cols, axis=1).astype(jnp.float32)


def mbconv_forward(x_nchw, params, images_per_step=None):
    x = x_nchw.astype(jnp.float32)
    N, Cin, H, W = (int(d) for d in x.shape)
    assert Cin == INPUT_FILTERS
    HW = H * W
    B = _choose_images_per_step(N) if images_per_step is None else int(images_per_step)
    assert N % B == 0
    steps = N // B
    LHW = B * HW

    # batch-on-lanes layout: [Cin, N*HW]  (column index = b*HW + h*W + w)
    x2 = x.reshape(N, Cin, HW).transpose(1, 0, 2).reshape(Cin, N * HW)

    # fold BN scales into the 1x1 conv weights (prep-time BN folding), cast MXU operands to bf16
    we = (params["expand_w"].T * params["bn0_scale"].reshape(OUP, 1)).astype(jnp.bfloat16)
    wp = (params["proj_w"].T * params["bn2_scale"].reshape(OUTPUT_FILTERS, 1)).astype(jnp.bfloat16)
    cp = _pack_channel_params(params)

    kernel = functools.partial(mbconv_kernel, H=H, W=W, nimg=B)

    out2 = pl.pallas_call(
        kernel,
        out_shape=jax.ShapeDtypeStruct((OUTPUT_FILTERS, N * HW), jnp.float32),
        grid=(steps,),
        in_specs=[
            pl.BlockSpec((Cin, LHW), lambda n: (0, n)),
            pl.BlockSpec((OUP, Cin), lambda n: (0, 0),
                         pipeline_mode=pl.Buffered(1)),
            pl.BlockSpec((OUTPUT_FILTERS, OUP), lambda n: (0, 0),
                         pipeline_mode=pl.Buffered(1)),
            pl.BlockSpec((OUP, CP_COLS), lambda n: (0, 0),
                         pipeline_mode=pl.Buffered(1)),
        ],
        out_specs=pl.BlockSpec((OUTPUT_FILTERS, LHW), lambda n: (0, n)),
        compiler_params=pltpu.CompilerParams(dimension_semantics=("parallel",)),
    )(x2, we, wp, cp)

    return out2.reshape(OUTPUT_FILTERS, N, H, W).transpose(1, 0, 2, 3)   # back to NCHW


# -------------------- deterministic parameter init --------------------

def init_params(key):
    keys = jax.random.split(key, 20)
    it = iter(keys)

    def nrm(shape, scale):
        return scale * jax.random.normal(next(it), shape, jnp.float32)

    def bn(c):
        gamma = 1.0 + 0.1 * jax.random.normal(next(it), (c,), jnp.float32)
        beta = 0.1 * jax.random.normal(next(it), (c,), jnp.float32)
        mean = 0.1 * jax.random.normal(next(it), (c,), jnp.float32)
        var = 1.0 + 0.2 * jax.random.uniform(next(it), (c,), jnp.float32)
        scale = gamma / jnp.sqrt(var + BN_EPS)
        shift = beta - mean * scale
        return scale.reshape(1, c), shift.reshape(1, c)

    params = {}
    params["expand_w"] = nrm((INPUT_FILTERS, OUP), 0.3)            # [Cin, Cexp] (1x1 conv)
    params["bn0_scale"], params["bn0_shift"] = bn(OUP)
    params["dw_w"] = nrm((KERNEL_SIZE, KERNEL_SIZE, OUP), 0.3)     # depthwise [K, K, Cexp]
    params["bn1_scale"], params["bn1_shift"] = bn(OUP)
    params["se_r_w"] = nrm((OUP, NUM_SQUEEZED), 0.3)
    params["se_r_b"] = nrm((1, NUM_SQUEEZED), 0.1)
    params["se_e_w"] = nrm((NUM_SQUEEZED, OUP), 0.3)
    params["se_e_b"] = nrm((1, OUP), 0.1)
    params["proj_w"] = nrm((OUP, OUTPUT_FILTERS), 0.3)             # [Cexp, Cout]
    params["bn2_scale"], params["bn2_shift"] = bn(OUTPUT_FILTERS)
    return params


# -------------------- pure-JAX reference --------------------

def mbconv_reference(x_nchw, params):
    x = jnp.transpose(x_nchw, (0, 2, 3, 1)).astype(jnp.float32)
    N, H, W, _ = x.shape
    p = KERNEL_SIZE // 2

    y = jnp.einsum('nhwc,co->nhwo', x, params["expand_w"])
    y = _swish(y * params["bn0_scale"][0] + params["bn0_shift"][0])

    yp = jnp.pad(y, ((0, 0), (p, p), (p, p), (0, 0)))
    acc = jnp.zeros((N, H, W, OUP), jnp.float32)
    for ki in range(KERNEL_SIZE):
        for kj in range(KERNEL_SIZE):
            acc = acc + yp[:, ki:ki + H, kj:kj + W, :] * params["dw_w"][ki, kj]
    y = _swish(acc * params["bn1_scale"][0] + params["bn1_shift"][0])

    pooled = jnp.mean(y, axis=(1, 2))                               # [N, C]
    sq = _swish(pooled @ params["se_r_w"] + params["se_r_b"][0])
    ex = sq @ params["se_e_w"] + params["se_e_b"][0]
    y = y * jax.nn.sigmoid(ex)[:, None, None, :]

    out = jnp.einsum('nhwc,co->nhwo', y, params["proj_w"])
    out = out * params["bn2_scale"][0] + params["bn2_shift"][0]
    if ID_SKIP and STRIDE == 1 and INPUT_FILTERS == OUTPUT_FILTERS:
        out = out + x
    return jnp.transpose(out, (0, 3, 1, 2))


if __name__ == "__main__":
    key = jax.random.PRNGKey(0)
    kx, kp = jax.random.split(key)
    params = init_params(kp)

    # primary check: batch=2 -> one image per grid step, 2 parallel steps (both v7x TCs)
    x = jax.random.normal(kx, (2, INPUT_FILTERS, 16, 16), jnp.float32)
    out = jax.block_until_ready(jax.jit(mbconv_forward)(x, params))
    assert out.shape == (2, OUTPUT_FILTERS, 16, 16)
    ref = jax.block_until_ready(mbconv_reference(x, params))
    # bf16 MXU operands with f32 accumulation -> keep a consciously widened tolerance
    np.testing.assert_allclose(np.asarray(out), np.asarray(ref), rtol=2e-2, atol=2e-2)

    # secondary check: batch=4 exercises the batch-on-lanes path (2 images per grid step)
    x4 = jax.random.normal(jax.random.PRNGKey(1), (4, INPUT_FILTERS, 16, 16), jnp.float32)
    out4 = jax.block_until_ready(jax.jit(mbconv_forward)(x4, params))
    ref4 = jax.block_until_ready(mbconv_reference(x4, params))
    np.testing.assert_allclose(np.asarray(out4), np.asarray(ref4), rtol=2e-2, atol=2e-2)

    print("KERNEL_OK")
</pallas_src>

<mosaic_0001>
module attributes {stable_mosaic.version = 11 : i64} {
  func.func @mbconv_kernel(%arg0: i32, %arg1: memref<8x256xf32, #tpu.memory_space<vmem>>, %arg2: memref<32x8xbf16, #tpu.memory_space<vmem>>, %arg3: memref<8x32xbf16, #tpu.memory_space<vmem>>, %arg4: memref<32x19xf32, #tpu.memory_space<vmem>>, %arg5: memref<8x256xf32, #tpu.memory_space<vmem>>) attributes {dimension_semantics = [#tpu.dimension_semantics<parallel>], iteration_bounds = array<i64: 2>, scalar_prefetch = 0 : i64, scratch_operands = 0 : i64, tpu.core_type = #tpu.core_type<tc>, window_params = [{transform_indices = @transform_0, window_bounds = array<i64: 8, 256>}, {pipeline_mode = #tpu.pipeline_mode<synchronous>, transform_indices = @transform_1, window_bounds = array<i64: 32, 8>}, {pipeline_mode = #tpu.pipeline_mode<synchronous>, transform_indices = @transform_2, window_bounds = array<i64: 8, 32>}, {pipeline_mode = #tpu.pipeline_mode<synchronous>, transform_indices = @transform_3, window_bounds = array<i64: 32, 19>}, {transform_indices = @transform_4, window_bounds = array<i64: 8, 256>}]} {
    %c0 = arith.constant 0 : index
    %c0_0 = arith.constant 0 : index
    %0 = vector.load %arg1[%c0, %c0_0] : memref<8x256xf32, #tpu.memory_space<vmem>>, vector<8x256xf32>
    %c0_1 = arith.constant 0 : index
    %c0_2 = arith.constant 0 : index
    %1 = vector.load %arg4[%c0_1, %c0_2] : memref<32x19xf32, #tpu.memory_space<vmem>>, vector<32x19xf32>
    %2 = tpu.iota {dimensions = array<i32: 1>} : vector<1x256xi32>
    %c15_i32 = arith.constant 15 : i32
    %3 = vector.broadcast %c15_i32 : i32 to vector<1x256xi32>
    %4 = arith.andi %2, %3 : vector<1x256xi32>
    %c255_i32 = arith.constant 255 : i32
    %5 = vector.broadcast %c255_i32 : i32 to vector<1x256xi32>
    %6 = arith.andi %2, %5 : vector<1x256xi32>
    %c4_i32 = arith.constant 4 : i32
    %7 = vector.broadcast %c4_i32 : i32 to vector<1x256xi32>
    %8 = arith.shrsi %6, %7 : vector<1x256xi32>
    %c0_3 = arith.constant 0 : index
    %c0_4 = arith.constant 0 : index
    %9 = vector.load %arg2[%c0_3, %c0_4] : memref<32x8xbf16, #tpu.memory_space<vmem>>, vector<32x8xbf16>
    %10 = arith.truncf %0 : vector<8x256xf32> to vector<8x256xbf16>
    %cst = arith.constant dense<0.000000e+00> : vector<32x256xf32>
    %11 = tpu.matmul %9, %10, %cst {dimension_numbers = #tpu.dot_dimension_numbers<[1], [0], [0], [1], [0, 0, 1, 1], [], []>} : vector<32x8xbf16>, vector<8x256xbf16>, vector<32x256xf32> -> vector<32x256xf32>
    %12 = vector.extract_strided_slice %1 {offsets = [0, 0], sizes = [32, 1], strides = [1, 1]} : vector<32x19xf32> to vector<32x1xf32>
    %13 = vector.broadcast %12 : vector<32x1xf32> to vector<32x256xf32>
    %14 = arith.addf %11, %13 : vector<32x256xf32>
    %15 = arith.negf %14 : vector<32x256xf32>
    %16 = math.exp %15 : vector<32x256xf32>
    %cst_5 = arith.constant 1.000000e+00 : f32
    %17 = vector.broadcast %cst_5 : f32 to vector<32x256xf32>
    %18 = arith.addf %17, %16 : vector<32x256xf32>
    %19 = arith.divf %17, %18 : vector<32x256xf32>
    %20 = arith.mulf %14, %19 : vector<32x256xf32>
    %c17_i32 = arith.constant 17 : i32
    %21 = tpu.dynamic_rotate %20 by %c17_i32 dim 1 : vector<32x256xf32>, i32 -> vector<32x256xf32>
    %22 = vector.extract_strided_slice %1 {offsets = [0, 4], sizes = [32, 1], strides = [1, 1]} : vector<32x19xf32> to vector<32x1xf32>
    %c1_i32 = arith.constant 1 : i32
    %23 = vector.broadcast %c1_i32 : i32 to vector<1x256xi32>
    %24 = arith.cmpi sge, %8, %23 : vector<1x256xi32>
    %c1_i32_6 = arith.constant 1 : i32
    %25 = vector.broadcast %c1_i32_6 : i32 to vector<1x256xi32>
    %26 = arith.cmpi sge, %4, %25 : vector<1x256xi32>
    %27 = arith.andi %24, %26 : vector<1x256xi1>
    %28 = vector.broadcast %22 : vector<32x1xf32> to vector<32x256xf32>
    %29 = arith.mulf %21, %28 : vector<32x256xf32>
    %30 = arith.extui %27 : vector<1x256xi1> to vector<1x256xi32>
    %31 = arith.sitofp %30 : vector<1x256xi32> to vector<1x256xf32>
    %32 = vector.broadcast %31 : vector<1x256xf32> to vector<32x256xf32>
    %33 = arith.mulf %29, %32 : vector<32x256xf32>
    %c16_i32 = arith.constant 16 : i32
    %34 = tpu.dynamic_rotate %20 by %c16_i32 dim 1 : vector<32x256xf32>, i32 -> vector<32x256xf32>
    %35 = vector.extract_strided_slice %1 {offsets = [0, 5], sizes = [32, 1], strides = [1, 1]} : vector<32x19xf32> to vector<32x1xf32>
    %c1_i32_7 = arith.constant 1 : i32
    %36 = vector.broadcast %c1_i32_7 : i32 to vector<1x256xi32>
    %37 = arith.cmpi sge, %8, %36 : vector<1x256xi32>
    %38 = vector.broadcast %35 : vector<32x1xf32> to vector<32x256xf32>
    %39 = arith.mulf %34, %38 : vector<32x256xf32>
    %40 = arith.extui %37 : vector<1x256xi1> to vector<1x256xi32>
    %41 = arith.sitofp %40 : vector<1x256xi32> to vector<1x256xf32>
    %42 = vector.broadcast %41 : vector<1x256xf32> to vector<32x256xf32>
    %43 = arith.mulf %39, %42 : vector<32x256xf32>
    %44 = arith.addf %33, %43 : vector<32x256xf32>
    %c15_i32_8 = arith.constant 15 : i32
    %45 = tpu.dynamic_rotate %20 by %c15_i32_8 dim 1 : vector<32x256xf32>, i32 -> vector<32x256xf32>
    %46 = vector.extract_strided_slice %1 {offsets = [0, 6], sizes = [32, 1], strides = [1, 1]} : vector<32x19xf32> to vector<32x1xf32>
    %c1_i32_9 = arith.constant 1 : i32
    %47 = vector.broadcast %c1_i32_9 : i32 to vector<1x256xi32>
    %48 = arith.cmpi sge, %8, %47 : vector<1x256xi32>
    %c15_i32_10 = arith.constant 15 : i32
    %49 = vector.broadcast %c15_i32_10 : i32 to vector<1x256xi32>
    %50 = arith.cmpi slt, %4, %49 : vector<1x256xi32>
    %51 = arith.andi %48, %50 : vector<1x256xi1>
    %52 = vector.broadcast %46 : vector<32x1xf32> to vector<32x256xf32>
    %53 = arith.mulf %45, %52 : vector<32x256xf32>
    %54 = arith.extui %51 : vector<1x256xi1> to vector<1x256xi32>
    %55 = arith.sitofp %54 : vector<1x256xi32> to vector<1x256xf32>
    %56 = vector.broadcast %55 : vector<1x256xf32> to vector<32x256xf32>
    %57 = arith.mulf %53, %56 : vector<32x256xf32>
    %58 = arith.addf %44, %57 : vector<32x256xf32>
    %c1_i32_11 = arith.constant 1 : i32
    %59 = tpu.dynamic_rotate %20 by %c1_i32_11 dim 1 : vector<32x256xf32>, i32 -> vector<32x256xf32>
    %60 = vector.extract_strided_slice %1 {offsets = [0, 7], sizes = [32, 1], strides = [1, 1]} : vector<32x19xf32> to vector<32x1xf32>
    %c1_i32_12 = arith.constant 1 : i32
    %61 = vector.broadcast %c1_i32_12 : i32 to vector<1x256xi32>
    %62 = arith.cmpi sge, %4, %61 : vector<1x256xi32>
    %63 = vector.broadcast %60 : vector<32x1xf32> to vector<32x256xf32>
    %64 = arith.mulf %59, %63 : vector<32x256xf32>
    %65 = arith.extui %62 : vector<1x256xi1> to vector<1x256xi32>
    %66 = arith.sitofp %65 : vector<1x256xi32> to vector<1x256xf32>
    %67 = vector.broadcast %66 : vector<1x256xf32> to vector<32x256xf32>
    %68 = arith.mulf %64, %67 : vector<32x256xf32>
    %69 = arith.addf %58, %68 : vector<32x256xf32>
    %70 = vector.extract_strided_slice %1 {offsets = [0, 8], sizes = [32, 1], strides = [1, 1]} : vector<32x19xf32> to vector<32x1xf32>
    %71 = vector.broadcast %70 : vector<32x1xf32> to vector<32x256xf32>
    %72 = arith.mulf %20, %71 : vector<32x256xf32>
    %73 = arith.addf %69, %72 : vector<32x256xf32>
    %c255_i32_13 = arith.constant 255 : i32
    %74 = tpu.dynamic_rotate %20 by %c255_i32_13 dim 1 : vector<32x256xf32>, i32 -> vector<32x256xf32>
    %75 = vector.extract_strided_slice %1 {offsets = [0, 9], sizes = [32, 1], strides = [1, 1]} : vector<32x19xf32> to vector<32x1xf32>
    %c15_i32_14 = arith.constant 15 : i32
    %76 = vector.broadcast %c15_i32_14 : i32 to vector<1x256xi32>
    %77 = arith.cmpi slt, %4, %76 : vector<1x256xi32>
    %78 = vector.broadcast %75 : vector<32x1xf32> to vector<32x256xf32>
    %79 = arith.mulf %74, %78 : vector<32x256xf32>
    %80 = arith.extui %77 : vector<1x256xi1> to vector<1x256xi32>
    %81 = arith.sitofp %80 : vector<1x256xi32> to vector<1x256xf32>
    %82 = vector.broadcast %81 : vector<1x256xf32> to vector<32x256xf32>
    %83 = arith.mulf %79, %82 : vector<32x256xf32>
    %84 = arith.addf %73, %83 : vector<32x256xf32>
    %c241_i32 = arith.constant 241 : i32
    %85 = tpu.dynamic_rotate %20 by %c241_i32 dim 1 : vector<32x256xf32>, i32 -> vector<32x256xf32>
    %86 = vector.extract_strided_slice %1 {offsets = [0, 10], sizes = [32, 1], strides = [1, 1]} : vector<32x19xf32> to vector<32x1xf32>
    %c15_i32_15 = arith.constant 15 : i32
    %87 = vector.broadcast %c15_i32_15 : i32 to vector<1x256xi32>
    %88 = arith.cmpi slt, %8, %87 : vector<1x256xi32>
    %c1_i32_16 = arith.constant 1 : i32
    %89 = vector.broadcast %c1_i32_16 : i32 to vector<1x256xi32>
    %90 = arith.cmpi sge, %4, %89 : vector<1x256xi32>
    %91 = arith.andi %88, %90 : vector<1x256xi1>
    %92 = vector.broadcast %86 : vector<32x1xf32> to vector<32x256xf32>
    %93 = arith.mulf %85, %92 : vector<32x256xf32>
    %94 = arith.extui %91 : vector<1x256xi1> to vector<1x256xi32>
    %95 = arith.sitofp %94 : vector<1x256xi32> to vector<1x256xf32>
    %96 = vector.broadcast %95 : vector<1x256xf32> to vector<32x256xf32>
    %97 = arith.mulf %93, %96 : vector<32x256xf32>
    %98 = arith.addf %84, %97 : vector<32x256xf32>
    %c240_i32 = arith.constant 240 : i32
    %99 = tpu.dynamic_rotate %20 by %c240_i32 dim 1 : vector<32x256xf32>, i32 -> vector<32x256xf32>
    %100 = vector.extract_strided_slice %1 {offsets = [0, 11], sizes = [32, 1], strides = [1, 1]} : vector<32x19xf32> to vector<32x1xf32>
    %c15_i32_17 = arith.constant 15 : i32
    %101 = vector.broadcast %c15_i32_17 : i32 to vector<1x256xi32>
    %102 = arith.cmpi slt, %8, %101 : vector<1x256xi32>
    %103 = vector.broadcast %100 : vector<32x1xf32> to vector<32x256xf32>
    %104 = arith.mulf %99, %103 : vector<32x256xf32>
    %105 = arith.extui %102 : vector<1x256xi1> to vector<1x256xi32>
    %106 = arith.sitofp %105 : vector<1x256xi32> to vector<1x256xf32>
    %107 = vector.broadcast %106 : vector<1x256xf32> to vector<32x256xf32>
    %108 = arith.mulf %104, %107 : vector<32x256xf32>
    %109 = arith.addf %98, %108 : vector<32x256xf32>
    %c239_i32 = arith.constant 239 : i32
    %110 = tpu.dynamic_rotate %20 by %c239_i32 dim 1 : vector<32x256xf32>, i32 -> vector<32x256xf32>
    %111 = vector.extract_strided_slice %1 {offsets = [0, 12], sizes = [32, 1], strides = [1, 1]} : vector<32x19xf32> to vector<32x1xf32>
    %c15_i32_18 = arith.constant 15 : i32
    %112 = vector.broadcast %c15_i32_18 : i32 to vector<1x256xi32>
    %113 = arith.cmpi slt, %8, %112 : vector<1x256xi32>
    %c15_i32_19 = arith.constant 15 : i32
    %114 = vector.broadcast %c15_i32_19 : i32 to vector<1x256xi32>
    %115 = arith.cmpi slt, %4, %114 : vector<1x256xi32>
    %116 = arith.andi %113, %115 : vector<1x256xi1>
    %117 = vector.broadcast %111 : vector<32x1xf32> to vector<32x256xf32>
    %118 = arith.mulf %110, %117 : vector<32x256xf32>
    %119 = arith.extui %116 : vector<1x256xi1> to vector<1x256xi32>
    %120 = arith.sitofp %119 : vector<1x256xi32> to vector<1x256xf32>
    %121 = vector.broadcast %120 : vector<1x256xf32> to vector<32x256xf32>
    %122 = arith.mulf %118, %121 : vector<32x256xf32>
    %123 = arith.addf %109, %122 : vector<32x256xf32>
    %124 = vector.extract_strided_slice %1 {offsets = [0, 1], sizes = [32, 1], strides = [1, 1]} : vector<32x19xf32> to vector<32x1xf32>
    %125 = vector.broadcast %124 : vector<32x1xf32> to vector<32x256xf32>
    %126 = arith.addf %123, %125 : vector<32x256xf32>
    %127 = arith.negf %126 : vector<32x256xf32>
    %128 = math.exp %127 : vector<32x256xf32>
    %cst_20 = arith.constant 1.000000e+00 : f32
    %129 = vector.broadcast %cst_20 : f32 to vector<32x256xf32>
    %130 = arith.addf %129, %128 : vector<32x256xf32>
    %131 = arith.divf %129, %130 : vector<32x256xf32>
    %132 = arith.mulf %126, %131 : vector<32x256xf32>
    %cst_21 = arith.constant dense<0.000000e+00> : vector<32xf32>
    %133 = vector.multi_reduction <add>, %132, %cst_21 [1] : vector<32x256xf32> to vector<32xf32>
    %134 = vector.shape_cast %133 : vector<32xf32> to vector<32x1xf32>
    %cst_22 = arith.constant 3.906250e-03 : f32
    %135 = vector.broadcast %cst_22 : f32 to vector<32x1xf32>
    %136 = arith.mulf %134, %135 : vector<32x1xf32>
    %137 = vector.extract_strided_slice %1 {offsets = [0, 3], sizes = [32, 1], strides = [1, 1]} : vector<32x19xf32> to vector<32x1xf32>
    %138 = vector.extract_strided_slice %1 {offsets = [0, 13], sizes = [32, 1], strides = [1, 1]} : vector<32x19xf32> to vector<32x1xf32>
    %139 = arith.mulf %138, %136 : vector<32x1xf32>
    %cst_23 = arith.constant dense<0.000000e+00> : vector<1xf32>
    %140 = vector.multi_reduction <add>, %139, %cst_23 [0] : vector<32x1xf32> to vector<1xf32>
    %141 = vector.shape_cast %140 : vector<1xf32> to vector<1x1xf32>
    %142 = vector.extract_strided_slice %1 {offsets = [0, 17], sizes = [1, 1], strides = [1, 1]} : vector<32x19xf32> to vector<1x1xf32>
    %143 = arith.addf %141, %142 : vector<1x1xf32>
    %144 = arith.negf %143 : vector<1x1xf32>
    %145 = math.exp %144 : vector<1x1xf32>
    %cst_24 = arith.constant 1.000000e+00 : f32
    %146 = vector.broadcast %cst_24 : f32 to vector<1x1xf32>
    %147 = arith.addf %146, %145 : vector<1x1xf32>
    %148 = arith.divf %146, %147 : vector<1x1xf32>
    %149 = arith.mulf %143, %148 : vector<1x1xf32>
    %150 = vector.extract_strided_slice %1 {offsets = [0, 15], sizes = [32, 1], strides = [1, 1]} : vector<32x19xf32> to vector<32x1xf32>
    %151 = vector.broadcast %149 : vector<1x1xf32> to vector<32x1xf32>
    %152 = arith.mulf %150, %151 : vector<32x1xf32>
    %153 = arith.addf %137, %152 : vector<32x1xf32>
    %154 = vector.extract_strided_slice %1 {offsets = [0, 14], sizes = [32, 1], strides = [1, 1]} : vector<32x19xf32> to vector<32x1xf32>
    %155 = arith.mulf %154, %136 : vector<32x1xf32>
    %cst_25 = arith.constant dense<0.000000e+00> : vector<1xf32>
    %156 = vector.multi_reduction <add>, %155, %cst_25 [0] : vector<32x1xf32> to vector<1xf32>
    %157 = vector.shape_cast %156 : vector<1xf32> to vector<1x1xf32>
    %158 = vector.extract_strided_slice %1 {offsets = [0, 18], sizes = [1, 1], strides = [1, 1]} : vector<32x19xf32> to vector<1x1xf32>
    %159 = arith.addf %157, %158 : vector<1x1xf32>
    %160 = arith.negf %159 : vector<1x1xf32>
    %161 = math.exp %160 : vector<1x1xf32>
    %cst_26 = arith.constant 1.000000e+00 : f32
    %162 = vector.broadcast %cst_26 : f32 to vector<1x1xf32>
    %163 = arith.addf %162, %161 : vector<1x1xf32>
    %164 = arith.divf %162, %163 : vector<1x1xf32>
    %165 = arith.mulf %159, %164 : vector<1x1xf32>
    %166 = vector.extract_strided_slice %1 {offsets = [0, 16], sizes = [32, 1], strides = [1, 1]} : vector<32x19xf32> to vector<32x1xf32>
    %167 = vector.broadcast %165 : vector<1x1xf32> to vector<32x1xf32>
    %168 = arith.mulf %166, %167 : vector<32x1xf32>
    %169 = arith.addf %153, %168 : vector<32x1xf32>
    %170 = arith.negf %169 : vector<32x1xf32>
    %171 = math.exp %170 : vector<32x1xf32>
    %cst_27 = arith.constant 1.000000e+00 : f32
    %172 = vector.broadcast %cst_27 : f32 to vector<32x1xf32>
    %173 = arith.addf %172, %171 : vector<32x1xf32>
    %174 = arith.divf %172, %173 : vector<32x1xf32>
    %175 = vector.broadcast %174 : vector<32x1xf32> to vector<32x256xf32>
    %176 = arith.mulf %132, %175 : vector<32x256xf32>
    %c0_28 = arith.constant 0 : index
    %c0_29 = arith.constant 0 : index
    %177 = vector.load %arg3[%c0_28, %c0_29] : memref<8x32xbf16, #tpu.memory_space<vmem>>, vector<8x32xbf16>
    %178 = arith.truncf %176 : vector<32x256xf32> to vector<32x256xbf16>
    %cst_30 = arith.constant dense<0.000000e+00> : vector<8x256xf32>
    %179 = tpu.matmul %177, %178, %cst_30 {dimension_numbers = #tpu.dot_dimension_numbers<[1], [0], [0], [1], [0, 0, 1, 1], [], []>} : vector<8x32xbf16>, vector<32x256xbf16>, vector<8x256xf32> -> vector<8x256xf32>
    %180 = vector.extract_strided_slice %1 {offsets = [0, 2], sizes = [8, 1], strides = [1, 1]} : vector<32x19xf32> to vector<8x1xf32>
    %181 = vector.broadcast %180 : vector<8x1xf32> to vector<8x256xf32>
    %182 = arith.addf %179, %181 : vector<8x256xf32>
    %183 = arith.addf %182, %0 : vector<8x256xf32>
    %c0_31 = arith.constant 0 : index
    %c0_32 = arith.constant 0 : index
    %184 = vector.load %arg5[%c0_31, %c0_32] : memref<8x256xf32, #tpu.memory_space<vmem>>, vector<8x256xf32>
    tpu.vector_store %arg5[%c0_31, %c0_32], %183 {strides = array<i32>} : memref<8x256xf32, #tpu.memory_space<vmem>>, vector<8x256xf32>,
    return
  }
  func.func @transform_0(%arg0: i32) -> (i32, i32) {
    %c0_i32 = arith.constant 0 : i32
    %c0_i32_0 = arith.constant 0 : i32
    return %c0_i32, %arg0 : i32, i32
  }
  func.func @transform_1(%arg0: i32) -> (i32, i32) {
    %c0_i32 = arith.constant 0 : i32
    %c0_i32_0 = arith.constant 0 : i32
    %c0_i32_1 = arith.constant 0 : i32
    return %c0_i32, %c0_i32_0 : i32, i32
  }
  func.func @transform_2(%arg0: i32) -> (i32, i32) {
    %c0_i32 = arith.constant 0 : i32
    %c0_i32_0 = arith.constant 0 : i32
    %c0_i32_1 = arith.constant 0 : i32
    return %c0_i32, %c0_i32_0 : i32, i32
  }
  func.func @transform_3(%arg0: i32) -> (i32, i32) {
    %c0_i32 = arith.constant 0 : i32
    %c0_i32_0 = arith.constant 0 : i32
    %c0_i32_1 = arith.constant 0 : i32
    return %c0_i32, %c0_i32_0 : i32, i32
  }
  func.func @transform_4(%arg0: i32) -> (i32, i32) {
    %c0_i32 = arith.constant 0 : i32
    %c0_i32_0 = arith.constant 0 : i32
    return %c0_i32, %arg0 : i32, i32
  }
}

</mosaic_0001>

<bundles_post_ra>
// kernel: mbconv_forward.1
= control target key start
LH: loop header
LB: loop body
LE: loop exit
PB: predicated region body
PF: predicated region fallthrough
CT: control target
= control target key end

     0   :  { %s1885_s15 = smov 0   ;;  %s2857_s0 = inlined_call_operand.vmem [shape: f32[8,512], index: 0, kind: input, shape index: {}]   ;;  %s2858_s1 = inlined_call_operand.vmem [shape: bf16[32,8], index: 1, kind: input, shape index: {}]   ;;  %s2859_s2 = inlined_call_operand.vmem [shape: bf16[8,32], index: 2, kind: input, shape index: {}]   ;;  %s2860_s3 = inlined_call_operand.vmem [shape: f32[32,19], index: 3, kind: input, shape index: {}]   ;;  %s2861_s4 = inlined_call_operand.vmem [shape: f32[8,512], index: 4, kind: output, shape index: {}]  }
   0x1 LB: > { %s1595_s16 = sadd.s32 4294967295, %s1832_s15   ;;  %p1599_p0 = scmp.ge.s32.totalorder %s1832_s15, 1  ;;  %s1832_s15 = sphi %s1885_s15, %s14_s15  }
   0x2   : > { %p163_p1 = scmp.lt.s32.totalorder %s1832_s15, 3 }
   0x4   : > { %p164_p2 = pnand %p1599_p0, %p163_p1 }
   0x6   : > { %167 = sbr.rel (%p164_p2) target bundleno = 1259 (0x4eb), region = 36 }
   0xb   : > { %v1896_v0 = vld [vmem:[%s2860_s3 + $0x10] sm:$0xff]  ;;  %v1901_v1 = vld [vmem:[%s2860_s3] sm:$0xff]  ;;  %s1600_s21 = sshll.u32 %s1595_s16, 1  ;;  %v1834_v2 = vmov 0   ;;  %v1910_v3 = vld [vmem:[%s2860_s3 + $0x8] sm:$0xff]  ;;  %v1835_v4 = vmov 5  }
   0xc   : > { %1695 = vset.pattern.permute.xlu1 %v1834_v2  ;;  %1694 = vset.pattern.permute.xlu0 %v1834_v2  ;;  %p190_p3 = scmp.lt.s32.totalorder %s1600_s21, 3  ;;  %v1924_v5 = vld [vmem:[%s2860_s3 + $0x18] sm:$0xff]  ;;  %vm260_vm0 = vcmask 1043456   ;;  %v1658_v12 = vld [vmem:[%s2858_s1] sm:$0xff]  ;;  %vm253_vm1 = vcmask 64512   ;;  %v1836_v13 = vmov 6  }
   0xd   : > { %235 = vperm.xlu1 %1695, %v1896_v0   ;;  %225 = vperm.xlu0 %1694, %v1901_v1   ;;  %v1837_v14 = vmov 4   ;;  %v1659_v15 = vld [vmem:[%s2858_s1 + $0x8] sm:$0xff]  ;;  %v1838_v16 = vmov 7   ;;  %v1839_v17 = vmov 8   ;;  %v1840_v18 = vmov 9   ;;  %s1842_s8 = smov 1  }
   0xe   : > { %s2901_s21 = smov (!%p190_p3, %s1600_s21), 3  ;;  %1698 = vset.pattern.permute.xlu2 %v1835_v4  ;;  %v1841_v19 = vmov 10   ;;  %s1843_s9 = smov 16  }
   0xf   : > { %562 = vperm.xlu2 %1698, %v1910_v3   ;;  %s1601_s24 = sshll.u32 %s2901_s21, 3  ;;  %s1844_s10 = smov 17  }
  0x10   : > { %s1919_s27 = scalar_lea.vmem %s2857_s0, %s1601_s24  ;;  %s1845_s11 = smov 15  }
  0x11   : > { %v202_v6 = vld [vmem:[%s1919_s27] sm:$0xff]  ;;  %v203_v7 = vld [vmem:[%s1919_s27 + $0x8] sm:$0xff]  ;;  %s1846_s12 = smov 127   ;;  %s1847_s13 = smov 113  }
  0x12   : > { %v221_v8 = vpack.c.bf16 %v202_v6, %v202_v6  ;;  %v222_v9 = vpack.c.bf16 %v203_v7, %v203_v7  ;;  %s1848_s14 = smov 112   ;;  %s1851_s16 = smov 111  }
  0x13   : > { %s1854_s28 = smov 124   ;;  %s1855_s29 = smov 2  }
  0x14   : > { %v262_v10 = vsel %vm260_vm0, %v221_v8, 0  ;;  %v265_v11 = vsel %vm260_vm0, %v222_v9, 0  ;;  %s1856_s30 = smov 116   ;;  %s1857_s5 = smov 115  }
  0x15   : > { %240 = vperm.xlu1 %1695, %v1924_v5   ;;  %230 = vperm.xlu0 %1694, %v1910_v3  }
  0x16   : > { %274 = vmatpush.bf16.msra.mxu0 %v262_v10  ;;  %293 = vmatpush.bf16.msra.mxu1 %v265_v11 }
  0x17   : > { %1699 = vset.pattern.permute.xlu2 %v1836_v13 }
  0x18   : > { %631 = vperm.xlu2 %1699, %v1901_v1  }
  0x19   : > { %1612 = vmatmul.msk.bf16.vlgmr.msra.gmra.mxu0 %vm253_vm1, %v1658_v12  ;;  %1614 = vmatmul.msk.bf16.vlgmr.msra.gmra.mxu1 %vm253_vm1, %v1658_v12 }
  0x1d   : > { %1697 = vset.pattern.permute.xlu1 %v1835_v4  ;;  %1696 = vset.pattern.permute.xlu0 %v1837_v14 }
  0x1e   : > { %558 = vperm.xlu1 %1697, %v1901_v1   ;;  %497 = vperm.xlu0 %1696, %v1901_v1  }
  0x20   : > { %1702 = vset.pattern.permute.xlu2 %v1835_v4 }
  0x21   : > { %570 = vperm.xlu2 %1702, %v1924_v5  }
  0x26   : > { %566 = vperm.xlu1 %1697, %v1896_v0   ;;  %501 = vperm.xlu0 %1696, %v1910_v3  }
  0x29   : > { %1613 = vmatmul.msk.bf16.gmra.mxu0 %vm253_vm1, %v1659_v15  ;;  %1615 = vmatmul.msk.bf16.gmra.mxu1 %vm253_vm1, %v1659_v15 }
  0x2a   : > { %1704 = vset.pattern.permute.xlu2 %v1838_v16 }
  0x2b   : > { %704 = vperm.xlu2 %1704, %v1910_v3  }
  0x2e   : > { %1701 = vset.pattern.permute.xlu1 %v1837_v14  ;;  %505 = vperm.xlu0 %1696, %v1896_v0  }
  0x2f   : > { %509 = vperm.xlu1 %1701, %v1924_v5  }
  0x33   : > { %708 = vperm.xlu2 %1704, %v1896_v0  }
  0x36   : > { %1700 = vset.pattern.permute.xlu0 %v1836_v13 }
  0x37   : > { %1703 = vset.pattern.permute.xlu1 %v1838_v16  ;;  %635 = vperm.xlu0 %1700, %v1910_v3  }
  0x38   : > { %700 = vperm.xlu1 %1703, %v1901_v1  }
  0x3b   : > { %1708 = vset.pattern.permute.xlu2 %v1839_v17 }
  0x3c   : > { %748 = vperm.xlu2 %1708, %v1910_v3  }
  0x3f   : > { %639 = vperm.xlu0 %1700, %v1896_v0  }
  0x40   : > { %1705 = vset.pattern.permute.xlu1 %v1836_v13 }
  0x41   : > { %643 = vperm.xlu1 %1705, %v1924_v5  }
  0x44   : > { %1710 = vset.pattern.permute.xlu2 %v1840_v18 }
  0x45   : > { %805 = vperm.xlu2 %1710, %v1910_v3  }
  0x47   : > { %1706 = vset.pattern.permute.xlu0 %v1838_v16 }
  0x48   : > { %712 = vperm.xlu0 %1706, %v1924_v5  }
  0x49   : > { %1707 = vset.pattern.permute.xlu1 %v1839_v17 }
  0x4a   : > { %744 = vperm.xlu1 %1707, %v1901_v1  }
  0x4d   : > { %1712 = vset.pattern.permute.xlu2 %v1841_v19 }
  0x4e   : > { %874 = vperm.xlu2 %1712, %v1901_v1  }
  0x50   : > { %1711 = vset.pattern.permute.xlu0 %v1839_v17 }
  0x51   : > { %752 = vperm.xlu0 %1711, %v1896_v0  }
  0x52   : > { %1709 = vset.pattern.permute.xlu1 %v1840_v18 }
  0x53   : > { %801 = vperm.xlu1 %1709, %v1901_v1  }
  0x56   : > { %1715 = vset.pattern.permute.xlu2 %v1840_v18 }
  0x59   : > { %1716 = vset.pattern.permute.xlu0 %v1841_v19 }
  0x5b   : > { %809 = vperm.xlu1 %1709, %v1896_v0  }
  0x63   : > { %1713 = vset.pattern.permute.xlu1 %v1841_v19 }
  0x64   : > { %878 = vperm.xlu1 %1713, %v1910_v3  }
  0x6c   : > { %1714 = vset.pattern.permute.xlu1 %v1839_v17 }
  0x7f   : > { %v226_v20 = vpop.permute.xlu0 %225  ;;  %v236_v51 = vpop.permute.xlu1 %235 }
  0x87   : > { %v231_v27 = vpop.permute.xlu0 %230 }
  0x96   : > { %v276_v21 = vpop.f32.mrf.mxu0  ;;  %v295_v22 = vpop.f32.mrf.mxu1 }
  0x97   : > { %v277_v23 = vadd.f32 %v276_v21, %v226_v20  ;;  %v1963_v24 = vadd.f32 %v295_v22, %v226_v20 }
  0x99   : > { %v1616_v25 = vmul.f32 -1.442695, %v277_v23  ;;  %v1617_v26 = vmul.f32 -1.442695, %v1963_v24 }
  0x9b   : > { %1731 = vpow2.f32 %v1616_v25 }
  0x9c   : > { %1733 = vpow2.f32 %v1617_v26 }
  0x9e   : > { %v278_v28 = vpop.f32.mrf.mxu0  ;;  %v297_v29 = vpop.f32.mrf.mxu1 }
  0x9f   : > { %v1966_v30 = vadd.f32 %v278_v28, %v231_v27  ;;  %v1968_v31 = vadd.f32 %v297_v29, %v231_v27 }
  0xa1   : > { %v1732_v32 = vpop.eup %1731  ;;  %v1618_v33 = vmul.f32 -1.442695, %v1966_v30  ;;  %v1619_v36 = vmul.f32 -1.442695, %v1968_v31 }
  0xa2   : > { %v1734_v34 = vpop.eup %1733  ;;  %v329_v35 = vadd.f32 1.0, %v1732_v32 }
  0xa3   : > { %v330_v37 = vadd.f32 1.0, %v1734_v34  ;;  %1735 = vpow2.f32 %v1618_v33 }
  0xa4   : > { %1737 = vrcp.f32 %v329_v35  ;;  %v346_v47 = vand.u32 2147483647, %v329_v35  ;;  %v348_v48 = vand.u32 2147483648, %v329_v35  ;;  %vm342_vm3 = vweird.f32 %v329_v35 }
  0xa5   : > { %1739 = vrcp.f32 %v330_v37  ;;  %v363_v63 = vand.u32 2147483648, %v330_v37  ;;  %vm357_vm7 = vweird.f32 %v330_v37  ;;  %v361_v7 = vand.u32 2147483647, %v330_v37 }
  0xa6   : > { %1741 = vpow2.f32 %v1619_v36  ;;  %v300_v53 = vpop.f32.mrf.mxu1  ;;  %vm347_vm5 = vcmp.eq.f32.partialorder %v346_v47, 8.507059e+37  ;;  %v349_v57 = vor.u32 1.1754944e-38, %v348_v48  ;;  %v281_v61 = vpop.f32.mrf.mxu0 }
  0xa7   : > { %v1975_v55 = vadd.f32 %v300_v53, %v236_v51  ;;  %v1981_v2 = vadd.f32 %v281_v61, %v236_v51  ;;  %v364_v13 = vor.u32 1.1754944e-38, %v363_v63  ;;  %vm362_vm9 = vcmp.eq.f32.partialorder %v361_v7, 8.507059e+37 }
  0xa9   : > { %v1736_v38 = vpop.eup %1735  ;;  %v1621_v8 = vmul.f32 -1.442695, %v1975_v55  ;;  %v1620_v15 = vmul.f32 -1.442695, %v1981_v2 }
  0xaa   : > { %v1738_v39 = vpop.eup %1737  ;;  %v1972_v40 = vadd.f32 1.0, %v1736_v38 }
  0xab   : > { %v1740_v41 = vpop.eup %1739  ;;  %v338_v42 = vmul.f32 %v1738_v39, %v329_v35  ;;  %vm343_vm2 = vweird.f32 %v1738_v39 }
  0xac   : > { %v1742_v43 = vpop.eup %1741  ;;  %v353_v44 = vmul.f32 %v1740_v41, %v330_v37  ;;  %1743 = vrcp.f32 %v1972_v40  ;;  %vm344_vm4 = vmor %vm342_vm3, %vm343_vm2  ;;  %vm358_vm6 = vweird.f32 %v1740_v41  ;;  %v378_v28 = vand.u32 2147483648, %v1972_v40  ;;  %v2018_v37 = vpop.permute.xlu2 %562 }
  0xad   : > { %v339_v45 = vsub.f32 1.0, %v338_v42  ;;  %v332_v46 = vadd.f32 1.0, %v1742_v43  ;;  %vm1986_vm8 = vmor %vm357_vm7, %vm358_vm6  ;;  %vm372_vm15 = vweird.f32 %v1972_v40 }
  0xae   : > { %v354_v49 = vsub.f32 1.0, %v353_v44  ;;  %v379_v36 = vor.u32 1.1754944e-38, %v378_v28  ;;  %v283_v43 = vpop.f32.mrf.mxu0 }
  0xaf   : > { %v340_v50 = vmul.f32 %v1738_v39, %v339_v45  ;;  %1745 = vrcp.f32 %v332_v46  ;;  %v391_v16 = vand.u32 2147483647, %v332_v46  ;;  %v393_v17 = vand.u32 2147483648, %v332_v46 }
  0xb0   : > { %v355_v52 = vmul.f32 %v1740_v41, %v354_v49  ;;  %1747 = vpow2.f32 %v1621_v8  ;;  %vm387_vm11 = vweird.f32 %v332_v46 }
  0xb1   : > { %v341_v54 = vadd.f32 %v1738_v39, %v340_v50  ;;  %1749 = vpow2.f32 %v1620_v15  ;;  %vm392_vm14 = vcmp.eq.f32.partialorder %v391_v16, 8.507059e+37  ;;  %v2068_v15 = vpop.permute.xlu0 %497 }
  0xb2   : > { %v1977_v56 = vpop.eup %1743  ;;  %v356_v59 = vadd.f32 %v1740_v41, %v355_v52 }
  0xb3   : > { %v345_v58 = vsel %vm344_vm4, %v1738_v39, %v341_v54  ;;  %v368_v60 = vmul.f32 %v1977_v56, %v1972_v40  ;;  %vm373_vm13 = vweird.f32 %v1977_v56 }
  0xb4   : > { %v350_v62 = vsel %vm347_vm5, %v349_v57, %v345_v58  ;;  %v360_v12 = vsel %vm1986_vm8, %v1740_v41, %v356_v59  ;;  %vm374_vm0 = vmor %vm372_vm15, %vm373_vm13  ;;  %v2029_v42 = vpop.permute.xlu2 %631 }
  0xb5   : > { %v1746_v4 = vpop.eup %1745  ;;  %v1983_v6 = vmul.f32 %v350_v62, %v277_v23  ;;  %v369_v10 = vsub.f32 1.0, %v368_v60  ;;  %v365_v18 = vsel %vm362_vm9, %v364_v13, %v360_v12  ;;  %v394_v23 = vor.u32 1.1754944e-38, %v393_v17 }
  0xb6   : > { %v383_v11 = vmul.f32 %v1746_v4, %v332_v46  ;;  %vm388_vm10 = vweird.f32 %v1746_v4  ;;  %v2001_v22 = vmul.f32 %v365_v18, %v1963_v24  ;;  %v1748_v27 = vpop.eup %1747  ;;  %v376_v24 = vand.u32 2147483647, %v1972_v40  ;;  %v241_v40 = vpop.permute.xlu1 %240 }
  0xb7   : > { %674 = vrot.lane.b32.xlu0 %v1983_v6, %s1842_s8  ;;  %532 = vrot.lane.b32.xlu1 %v1983_v6, %s1843_s9  ;;  %v370_v19 = vmul.f32 %v1977_v56, %v369_v10  ;;  %vm389_vm12 = vmor %vm387_vm11, %vm388_vm10  ;;  %v1750_v33 = vpop.eup %1749  ;;  %v334_v35 = vadd.f32 1.0, %v1748_v27 }
  0xb8   : > { %v384_v14 = vsub.f32 1.0, %v383_v11  ;;  %465 = vrot.lane.b32.xlu2 %v1983_v6, %s1844_s10  ;;  %vm377_vm1 = vcmp.eq.f32.partialorder %v376_v24, 8.507059e+37  ;;  %v333_v39 = vadd.f32 1.0, %v1750_v33 }
  0xb9   : > { %v371_v25 = vadd.f32 %v1977_v56, %v370_v19  ;;  %1751 = vrcp.f32 %v334_v35  ;;  %vm417_vm2 = vweird.f32 %v334_v35  ;;  %v423_v54 = vand.u32 2147483648, %v334_v35 }
  0xba   : > { %v385_v20 = vmul.f32 %v1746_v4, %v384_v14  ;;  %1753 = vrcp.f32 %v333_v39  ;;  %v421_v57 = vand.u32 2147483647, %v334_v35  ;;  %vm402_vm4 = vweird.f32 %v333_v39 }
  0xbb   : > { %v375_v34 = vsel %vm374_vm0, %v1977_v56, %v371_v25  ;;  %v408_v60 = vand.u32 2147483648, %v333_v39  ;;  %v406_v62 = vand.u32 2147483647, %v333_v39  ;;  %v424_v63 = vor.u32 1.1754944e-38, %v423_v54  ;;  %v2087_v25 = vpop.permute.xlu0 %501 }
  0xbc   : > { %v386_v21 = vadd.f32 %v1746_v4, %v385_v20  ;;  %v380_v38 = vsel %vm377_vm1, %v379_v36, %v375_v34  ;;  %v2044_v52 = vpop.permute.xlu2 %570  ;;  %vm422_vm8 = vcmp.eq.f32.partialorder %v421_v57, 8.507059e+37 }
  0xbd   : > { %2873 = vst [vmem:[#allocation2_spill] sm:$0xff] %v2044_v52  ;;  %v409_v9 = vor.u32 1.1754944e-38, %v408_v60  ;;  %vm407_vm9 = vcmp.eq.f32.partialorder %v406_v62, 8.507059e+37  ;;  %v2886_v52 = vmov 0.0  }
  0xbe   : > { %v390_v26 = vsel %vm389_vm12, %v1746_v4, %v386_v21  ;;  %v2039_v47 = vpop.permute.xlu1 %558  ;;  %v302_v4 = vpop.f32.mrf.mxu1 }
  0xbf   : > { %v395_v29 = vsel %vm392_vm14, %v394_v23, %v390_v26  ;;  %540 = vrot.lane.b32.xlu1 %v2001_v22, %s1843_s9  ;;  %v1752_v41 = vpop.eup %1751  ;;  %v2062_v10 = vadd.f32 %v302_v4, %v241_v40  ;;  %v208_v4 = vlaneseq }
  0xc0   : > { %v2011_v32 = vmul.f32 %v395_v29, %v1968_v31  ;;  %473 = vrot.lane.b32.xlu2 %v2001_v22, %s1844_s10  ;;  %v2023_v31 = vmul.f32 %v380_v38, %v1966_v30  ;;  %v1754_v44 = vpop.eup %1753  ;;  %v413_v45 = vmul.f32 %v1752_v41, %v334_v35  ;;  %v2035_v30 = vadd.f32 %v283_v43, %v241_v40 }
  0xc1   : > { %v398_v46 = vmul.f32 %v1754_v44, %v333_v39  ;;  %vm418_vm3 = vweird.f32 %v1752_v41  ;;  %vm403_vm5 = vweird.f32 %v1754_v44  ;;  %v1623_v18 = vmul.f32 -1.442695, %v2062_v10 }
  0xc2   : > { %475 = vrot.lane.b32.xlu0 %v2011_v32, %s1844_s10  ;;  %v414_v48 = vsub.f32 1.0, %v413_v45  ;;  %v1622_v49 = vmul.f32 -1.442695, %v2035_v30  ;;  %vm2050_vm6 = vmor %vm417_vm2, %vm418_vm3 }
  0xc3   : > { %v399_v50 = vsub.f32 1.0, %v398_v46  ;;  %vm404_vm7 = vmor %vm402_vm4, %vm403_vm5  ;;  %v2103_v33 = vpop.permute.xlu0 %505 }
  0xc4   : > { %v415_v51 = vmul.f32 %v1752_v41, %v414_v48  ;;  %1755 = vpow2.f32 %v1622_v49  ;;  %v2064_v13 = vpop.permute.xlu2 %704 }
  0xc5   : > { %v400_v53 = vmul.f32 %v1754_v44, %v399_v50 }
  0xc6   : > { %v416_v56 = vadd.f32 %v1752_v41, %v415_v51  ;;  %v2054_v59 = vpop.permute.xlu1 %566 }
  0xc7   : > { %609 = vrot.lane.b32.xlu1 %v2001_v22, %s1845_s11  ;;  %v401_v61 = vadd.f32 %v1754_v44, %v400_v53 }
  0xc8   : > { %601 = vrot.lane.b32.xlu2 %v1983_v6, %s1845_s11  ;;  %v420_v8 = vsel %vm2050_vm6, %v1752_v41, %v416_v56 }
  0xc9   : > { %v405_v11 = vsel %vm404_vm7, %v1754_v44, %v401_v61  ;;  %v425_v12 = vsel %vm422_vm8, %v424_v63, %v420_v8  ;;  %v2145_v8 = vand.u32 127, %v208_v4 }
  0xca   : > { %603 = vrot.lane.b32.xlu0 %v2023_v31, %s1845_s11  ;;  %v1756_v7 = vpop.eup %1755  ;;  %v410_v16 = vsel %vm407_vm9, %v409_v9, %v405_v11  ;;  %v2071_v17 = vmul.f32 %v425_v12, %v1975_v55 }
  0xcb   : > { %v335_v14 = vadd.f32 1.0, %v1756_v7  ;;  %v2079_v20 = vmul.f32 %v410_v16, %v1981_v2  ;;  %v2117_v48 = vpop.permute.xlu0 %635  ;;  %vm481_vm2 = vcmp.lt.s32.totalorder %v2145_v8, 17  ;;  %v210_v16 = vadd.s32 128, %v2145_v8 }
  0xcc   : > { %v2085_v21 = vpop.permute.xlu2 %708  ;;  %vm690_vm3 = vcmp.lt.s32.totalorder %v2145_v8, 1 }
  0xcd   : > { %1757 = vrcp.f32 %v335_v14  ;;  %vm432_vm10 = vweird.f32 %v335_v14  ;;  %v438_v34 = vand.u32 2147483648, %v335_v14  ;;  %v436_v36 = vand.u32 2147483647, %v335_v14 }
  0xce   : > { %v2074_v19 = vpop.permute.xlu1 %509  ;;  %1759 = vpow2.f32 %v1623_v18 }
  0xcf   : > { %783 = vrot.lane.b32.xlu1 %v2001_v22, %s1846_s12  ;;  %v439_v40 = vor.u32 1.1754944e-38, %v438_v34  ;;  %vm437_vm13 = vcmp.eq.f32.partialorder %v436_v36, 8.507059e+37  ;;  %v212_v34 = vand.u32 15, %v210_v16 }
  0xd0   : > { %682 = vrot.lane.b32.xlu2 %v2001_v22, %s1842_s8 }
  0xd1   : > { %vm2192_vm7 = vcmp.ge.s32.totalorder %v212_v34, 1 }
  0xd2   : > { %684 = vrot.lane.b32.xlu0 %v2011_v32, %s1842_s8 }
  0xd3   : > { %v1758_v55 = vpop.eup %1757  ;;  %v2132_v57 = vpop.permute.xlu0 %639 }
  0xd4   : > { %v1760_v23 = vpop.eup %1759  ;;  %v428_v26 = vmul.f32 %v1758_v55, %v335_v14  ;;  %v2097_v29 = vpop.permute.xlu2 %748  ;;  %vm433_vm11 = vweird.f32 %v1758_v55 }
  0xd5   : > { %v336_v27 = vadd.f32 1.0, %v1760_v23  ;;  %vm434_vm12 = vmor %vm432_vm10, %vm433_vm11  ;;  %v213_v23 = vand.u32 255, %v2145_v8  ;;  %vm548_vm10 = vcmp.lt.s32.totalorder %v2145_v8, 16 }
  0xd6   : > { %v2093_v2 = vpop.permute.xlu1 %700  ;;  %v429_v28 = vsub.f32 1.0, %v428_v26 }
  0xd7   : > { %852 = vrot.lane.b32.xlu1 %v2001_v22, %s1847_s13  ;;  %1761 = vrcp.f32 %v336_v27  ;;  %vm447_vm14 = vweird.f32 %v336_v27  ;;  %v453_v54 = vand.u32 2147483648, %v336_v27 }
  0xd8   : > { %775 = vrot.lane.b32.xlu2 %v1983_v6, %s1846_s12  ;;  %v430_v24 = vmul.f32 %v1758_v55, %v429_v28  ;;  %v211_v28 = vand.u32 15, %v2145_v8 }
  0xd9   : > { %v454_v60 = vor.u32 1.1754944e-38, %v453_v54 }
  0xda   : > { %777 = vrot.lane.b32.xlu0 %v2023_v31, %s1846_s12  ;;  %v431_v35 = vadd.f32 %v1758_v55, %v430_v24  ;;  %v2175_v24 = vshra.s32 %v213_v23, 4  ;;  %vm2185_vm5 = vcmp.ge.s32.totalorder %v211_v28, 1  ;;  %vm2238_vm11 = vcmp.lt.s32.totalorder %v211_v28, 15 }
  0xdb   : > { %v2147_v9 = vpop.permute.xlu0 %712 }
  0xdc   : > { %v2109_v41 = vpop.permute.xlu2 %805  ;;  %v435_v43 = vsel %vm434_vm12, %v1758_v55, %v431_v35  ;;  %2876 = vst [vmem:[#allocation3_spill] sm:$0xff] %v2147_v9  ;;  %vm490_vm4 = vcmp.ge.s32.totalorder %v2175_v24, 1  ;;  %vm2242_vm12 = vcmp.lt.s32.totalorder %v212_v34, 15 }
  0xdd   : > { %v1762_v39 = vpop.eup %1761  ;;  %v440_v45 = vsel %vm437_vm13, %v439_v40, %v435_v43  ;;  %vm494_vm8 = vmand %vm490_vm4, %vm2185_vm5 }
  0xde   : > { %v2107_v38 = vpop.permute.xlu1 %643  ;;  %v443_v44 = vmul.f32 %v1762_v39, %v336_v27  ;;  %v2120_v49 = vmul.f32 %v440_v45, %v2035_v30  ;;  %vm448_vm15 = vweird.f32 %v1762_v39  ;;  %v451_v30 = vand.u32 2147483647, %v336_v27  ;;  %vm628_vm13 = vmand %vm490_vm4, %vm2238_vm11 }
  0xdf   : > { %676 = vrot.lane.b32.xlu1 %v2023_v31, %s1842_s8  ;;  %vm449_vm0 = vmor %vm447_vm14, %vm448_vm15  ;;  %v214_v27 = vand.u32 255, %v210_v16  ;;  %vm617_vm14 = vcmp.lt.s32.totalorder %v2145_v8, 15 }
  0xe0   : > { %844 = vrot.lane.b32.xlu2 %v1983_v6, %s1847_s13  ;;  %v444_v46 = vsub.f32 1.0, %v443_v44  ;;  %vm452_vm1 = vcmp.eq.f32.partialorder %v451_v30, 8.507059e+37 }
  0xe1   : > { %v2177_v35 = vshra.s32 %v214_v27, 4  ;;  %v2883_v27 = vmov 0 }
  0xe2   : > { %846 = vrot.lane.b32.xlu0 %v2023_v31, %s1847_s13  ;;  %v445_v51 = vmul.f32 %v1762_v39, %v444_v46  ;;  %v2884_v27 = vsel %vm2242_vm12, 4294967295, %v2883_v27 }
  0xe3   : > { %v2169_v55 = vpop.permute.xlu0 %752  ;;  %vm491_vm6 = vcmp.ge.s32.totalorder %v2177_v35, 1  ;;  %2885 = vst [vmem:[#allocation4_spill] sm:$0xff] %v2884_v27 }
  0xe4   : > { %v2128_v53 = vpop.permute.xlu2 %874  ;;  %v446_v56 = vadd.f32 %v1762_v39, %v445_v51  ;;  %vm495_vm9 = vmand %vm491_vm6, %vm2192_vm7  ;;  %v2863_v51 = vmov 0.0  }
  0xe5   : > { %v2214_v54 = vsel %vm494_vm8, 1.0, %v2863_v51  ;;  %vm629_vm15 = vmand %vm491_vm6, %vm2242_vm12  ;;  %v2286_v9 = vsel %vm2192_vm7, 1.0, %v2863_v51  ;;  %vm860_vm8 = vcmp.lt.s32.totalorder %v2145_v8, 113 }
  0xe6   : > { %v2122_v50 = vpop.permute.xlu1 %744  ;;  %v450_v61 = vsel %vm449_vm0, %v1762_v39, %v446_v56  ;;  %v2217_v56 = vsel %vm495_vm9, 1.0, %v2863_v51  ;;  %vm791_vm0 = vcmp.lt.s32.totalorder %v2145_v8, 127 }
  0xe7   : > { %477 = vrot.lane.b32.xlu1 %v2071_v17, %s1844_s10  ;;  %v455_v62 = vsel %vm452_vm1, %v454_v60, %v450_v61  ;;  %vm869_vm1 = vcmp.lt.s32.totalorder %v2175_v24, 15 }
  0xe8   : > { %467 = vrot.lane.b32.xlu2 %v2023_v31, %s1844_s10  ;;  %v2143_v7 = vmul.f32 %v455_v62, %v2062_v10  ;;  %v2225_v62 = vsel %vm490_vm4, 1.0, %v2863_v51  ;;  %vm870_vm4 = vcmp.lt.s32.totalorder %v2177_v35, 15 }
  0xe9   : > { %vm872_vm9 = vmand %vm870_vm4, %vm2192_vm7 }
  0xea   : > { %469 = vrot.lane.b32.xlu0 %v2079_v20, %s1844_s10  ;;  %vm1012_vm7 = vmand %vm870_vm4, %vm2242_vm12 }
  0xee   : > { %v2134_v58 = vpop.permute.xlu1 %801 }
  0xef   : > { %544 = vrot.lane.b32.xlu1 %v2071_v17, %s1843_s9 }
  0xf0   : > { %534 = vrot.lane.b32.xlu2 %v2023_v31, %s1843_s9 }
  0xf2   : > { %536 = vrot.lane.b32.xlu0 %v2079_v20, %s1843_s9 }
  0xf6   : > { %v2149_v11 = vpop.permute.xlu1 %809 }
  0xf7   : > { %605 = vrot.lane.b32.xlu1 %v2079_v20, %s1845_s11 }
  0xf8   : > { %542 = vrot.lane.b32.xlu2 %v2011_v32, %s1843_s9 }
  0xfa   : > { %686 = vrot.lane.b32.xlu0 %v2071_v17, %s1842_s8 }
  0xfe   : > { %v2165_v18 = vpop.permute.xlu1 %878 }
  0xff   : > { %787 = vrot.lane.b32.xlu1 %v2071_v17, %s1846_s12 }
 0x100   : > { %611 = vrot.lane.b32.xlu2 %v2011_v32, %s1845_s11 }
 0x102   : > { %779 = vrot.lane.b32.xlu0 %v2079_v20, %s1846_s12 }
 0x107   : > { %471 = vrot.lane.b32.xlu1 %v2120_v49, %s1844_s10 }
 0x108   : > { %785 = vrot.lane.b32.xlu2 %v2011_v32, %s1846_s12 }
 0x10a   : > { %607 = vrot.lane.b32.xlu0 %v2120_v49, %s1845_s11 }
 0x10f   : > { %538 = vrot.lane.b32.xlu1 %v2120_v49, %s1843_s9 }
 0x110   : > { %854 = vrot.lane.b32.xlu2 %v2011_v32, %s1847_s13 }
 0x112   : > { %680 = vrot.lane.b32.xlu0 %v2120_v49, %s1842_s8  ;;  %v466_v63 = vpop.permute.xlu2 %465 }
 0x117   : > { %615 = vrot.lane.b32.xlu1 %v2143_v7, %s1845_s11 }
 0x118   : > { %613 = vrot.lane.b32.xlu2 %v2071_v17, %s1845_s11 }
 0x11a   : > { %789 = vrot.lane.b32.xlu0 %v2143_v7, %s1846_s12  ;;  %v474_v12 = vpop.permute.xlu2 %473 }
 0x11b   : > { %v482_v10 = vsel %vm481_vm2, %v466_v63, %v474_v12  ;;  %v486_v14 = vsel %vm481_vm2, %v474_v12, %v466_v63  ;;  %v2230_v63 = vsel %vm491_vm6, 1.0, %v2863_v51  ;;  %vm871_vm6 = vmand %vm869_vm1, %vm2185_vm5 }
 0x11c   : > { %v512_v30 = vmul.f32 %v2068_v15, %v486_v14  ;;  %v513_v60 = vmul.f32 %v2068_v15, %v482_v10  ;;  %v2344_v40 = vsel %vm871_vm6, 1.0, %v2886_v52 }
 0x11f   : > { %688 = vrot.lane.b32.xlu1 %v2143_v7, %s1842_s8 }
 0x120   : > { %678 = vrot.lane.b32.xlu2 %v2079_v20, %s1842_s8 }
 0x122   : > { %917 = vrot.lane.b32.xlu0 %v1983_v6, %s1848_s14  ;;  %v602_v26 = vpop.permute.xlu2 %601 }
 0x127   : > { %848 = vrot.lane.b32.xlu1 %v2079_v20, %s1847_s13 }
 0x128   : > { %479 = vrot.lane.b32.xlu2 %v2143_v7, %s1844_s10 }
 0x129   : > { %v675_v36 = vpop.permute.xlu0 %674  ;;  %v533_v39 = vpop.permute.xlu1 %532 }
 0x12a   : > { %927 = vrot.lane.b32.xlu0 %v2011_v32, %s1848_s14  ;;  %v683_v43 = vpop.permute.xlu2 %682 }
 0x12b   : > { %v691_v45 = vsel %vm690_vm3, %v675_v36, %v683_v43  ;;  %v695_v46 = vsel %vm690_vm3, %v683_v43, %v675_v36  ;;  %v524_v36 = vmul.f32 %v2214_v54, %v512_v30  ;;  %v525_v43 = vmul.f32 %v2217_v56, %v513_v60 }
 0x12c   : > { %v2265_v30 = vsel %vm628_vm13, 1.0, %v2863_v51  ;;  %v2268_v60 = vsel %vm629_vm15, 1.0, %v2863_v51 }
 0x12f   : > { %919 = vrot.lane.b32.xlu1 %v2023_v31, %s1848_s14 }
 0x130   : > { %546 = vrot.lane.b32.xlu2 %v2143_v7, %s1843_s9 }
 0x131   : > { %v541_v61 = vpop.permute.xlu1 %540 }
 0x132   : > { %882 = vperm.xlu0 %1716, %v1896_v0   ;;  %v549_v4 = vsel %vm548_vm10, %v533_v39, %v541_v61  ;;  %v553_v12 = vsel %vm548_vm10, %v541_v61, %v533_v39  ;;  %v776_v15 = vpop.permute.xlu2 %775 }
 0x133   : > { %v573_v10 = vmul.f32 %v2039_v47, %v553_v12  ;;  %v574_v14 = vmul.f32 %v2039_v47, %v549_v4 }
 0x134   : > { %v476_v23 = vpop.permute.xlu0 %475 }
 0x135   : > { %v585_v39 = vmul.f32 %v2225_v62, %v573_v10  ;;  %v586_v61 = vmul.f32 %v2230_v63, %v574_v14  ;;  %v715_v14 = vmul.f32 %v2093_v2, %v695_v46 }
 0x137   : > { %v593_v47 = vadd.f32 %v585_v39, %v524_v36  ;;  %v594_v28 = vadd.f32 %v586_v61, %v525_v43  ;;  %756 = vperm.xlu1 %1714, %v1924_v5   ;;  %v716_v36 = vmul.f32 %v2093_v2, %v691_v45  ;;  %v2281_v61 = vsel %vm2185_vm5, 1.0, %v2863_v51  ;;  %vm1011_vm5 = vmand %vm869_vm1, %vm2238_vm11 }
 0x138   : > { %781 = vrot.lane.b32.xlu2 %v2120_v49, %s1846_s12  ;;  %v759_v51 = vmul.f32 %v2122_v50, %v1983_v6  ;;  %s199_s12 = scalar_lea.vmem %s2861_s4, %s1601_s24 }
 0x139   : > { %v610_v34 = vpop.permute.xlu1 %609  ;;  %v728_v45 = vmul.f32 %v2286_v9, %v716_v36  ;;  %v2313_v36 = vsel %vm2242_vm12, 1.0, %v2886_v52 }
 0x13a   : > { %921 = vrot.lane.b32.xlu0 %v2079_v20, %s1848_s14  ;;  %v618_v4 = vsel %vm617_vm14, %v602_v26, %v610_v34  ;;  %v622_v12 = vsel %vm617_vm14, %v610_v34, %v602_v26  ;;  %v845_v10 = vpop.permute.xlu2 %844 }
 0x13b   : > { %v646_v43 = vmul.f32 %v2029_v42, %v622_v12  ;;  %v647_v39 = vmul.f32 %v2029_v42, %v618_v4  ;;  %v727_v42 = vmul.f32 %v2281_v61, %v715_v14  ;;  %v2866_v12 = vmov 11  }
 0x13c   : > { %v2288_v26 = vpop.permute.xlu0 %603 }
 0x13d   : > { %v658_v46 = vmul.f32 %v2265_v30, %v646_v43  ;;  %v659_v2 = vmul.f32 %v2268_v60, %v647_v39  ;;  %v760_v43 = vmul.f32 %v2122_v50, %v2001_v22 }
 0x13f   : > { %v666_v34 = vadd.f32 %v658_v46, %v593_v47  ;;  %v667_v4 = vadd.f32 %v659_v2, %v594_v28  ;;  %1717 = vset.pattern.permute.xlu1 %v2866_v12  ;;  %v2306_v47 = vsel %vm2238_vm11, 1.0, %v2886_v52 }
 0x140   : > { %856 = vrot.lane.b32.xlu2 %v2071_v17, %s1847_s13  ;;  %943 = vperm.xlu1 %1717, %v1901_v1  }
 0x141   : > { %v735_v39 = vadd.f32 %v727_v42, %v666_v34  ;;  %v736_v14 = vadd.f32 %v728_v45, %v667_v4  ;;  %v784_v28 = vpop.permute.xlu1 %783 }
 0x142   : > { %988 = vrot.lane.b32.xlu0 %v2023_v31, %s1851_s16  ;;  %v792_v1 = vsel %vm791_vm0, %v776_v15, %v784_v28  ;;  %v796_v50 = vsel %vm791_vm0, %v784_v28, %v776_v15  ;;  %v468_v46 = vpop.permute.xlu2 %467 }
 0x143   : > { %v767_v2 = vadd.f32 %v759_v51, %v735_v39  ;;  %v768_v42 = vadd.f32 %v760_v43, %v736_v14  ;;  %v816_v45 = vmul.f32 %v2134_v58, %v792_v1  ;;  %v817_v34 = vmul.f32 %v2134_v58, %v796_v50 }
 0x144   : > { %v685_v4 = vpop.permute.xlu0 %684  ;;  %v483_v12 = vsel %vm481_vm2, %v468_v46, %v476_v23  ;;  %v487_v27 = vsel %vm481_vm2, %v476_v23, %v468_v46  ;;  %v2347_v43 = vsel %vm872_vm9, 1.0, %v2886_v52 }
 0x145   : > { %v828_v15 = vmul.f32 %v2306_v47, %v816_v45  ;;  %v829_v28 = vmul.f32 %v2313_v36, %v817_v34 }
 0x147   : > { %v836_v51 = vadd.f32 %v828_v15, %v767_v2  ;;  %v837_v58 = vadd.f32 %v829_v28, %v768_v42  ;;  %v514_v15 = vmul.f32 %v2087_v25, %v487_v27  ;;  %v515_v28 = vmul.f32 %v2087_v25, %v483_v12 }
 0x148   : > { %925 = vrot.lane.b32.xlu2 %v2001_v22, %s1848_s14  ;;  %850 = vrot.lane.b32.xlu1 %v2120_v49, %s1847_s13 }
 0x149   : > { %v853_v23 = vpop.permute.xlu1 %852 }
 0x14a   : > { %886 = vperm.xlu0 %1716, %v1924_v5   ;;  %v861_v44 = vsel %vm860_vm8, %v845_v10, %v853_v23  ;;  %v865_v39 = vsel %vm860_vm8, %v853_v23, %v845_v10  ;;  %v535_v14 = vpop.permute.xlu2 %534 }
 0x14b   : > { %v889_v1 = vmul.f32 %v2128_v53, %v861_v44  ;;  %v890_v50 = vmul.f32 %v2128_v53, %v865_v39  ;;  %v2869_v44 = vmov 12  }
 0x14c   : > { %v778_v46 = vpop.permute.xlu0 %777 }
 0x14d   : > { %v901_v2 = vmul.f32 %v2344_v40, %v889_v1  ;;  %v902_v42 = vmul.f32 %v2347_v43, %v890_v50  ;;  %v527_v1 = vmul.f32 %v2217_v56, %v515_v28 }
 0x14f   : > { %v2357_v45 = vadd.f32 %v901_v2, %v836_v51  ;;  %v2359_v34 = vadd.f32 %v902_v42, %v837_v58 }
 0x150   : > { %813 = vperm.xlu2 %1715, %v1924_v5   ;;  %929 = vrot.lane.b32.xlu1 %v2071_v17, %s1848_s14 }
 0x151   : > { %v677_v10 = vpop.permute.xlu1 %676 }
 0x152   : > { %v692_v53 = vsel %vm690_vm3, %v677_v10, %v685_v4  ;;  %v696_v23 = vsel %vm690_vm3, %v685_v4, %v677_v10  ;;  %v543_v51 = vpop.permute.xlu2 %542  ;;  %1720 = vset.pattern.permute.xlu0 %v2869_v44  ;;  %v526_v4 = vmul.f32 %v2214_v54, %v514_v15  ;;  %v2887_v44 = vmov 11  }
 0x153   : > { %v550_v58 = vsel %vm548_vm10, %v535_v14, %v543_v51  ;;  %v554_v39 = vsel %vm548_vm10, %v543_v51, %v535_v14  ;;  %1018 = vperm.xlu0 %1720, %v1910_v3   ;;  %v717_v28 = vmul.f32 %v2064_v13, %v696_v23 }
 0x154   : > { %v2376_v27 = vpop.permute.xlu0 %846  ;;  %v575_v25 = vmul.f32 %v2018_v37, %v554_v39  ;;  %v576_v12 = vmul.f32 %v2018_v37, %v550_v58  ;;  %v718_v58 = vmul.f32 %v2064_v13, %v692_v53 }
 0x155   : > { %v729_v23 = vmul.f32 %v2281_v61, %v717_v28 }
 0x156   : > { %v587_v50 = vmul.f32 %v2225_v62, %v575_v25  ;;  %v588_v2 = vmul.f32 %v2230_v63, %v576_v12  ;;  %v730_v13 = vmul.f32 %v2286_v9, %v718_v58 }
 0x158   : > { %v595_v42 = vadd.f32 %v587_v50, %v526_v4  ;;  %v596_v10 = vadd.f32 %v588_v2, %v527_v1  ;;  %1718 = vset.pattern.permute.xlu2 %v2887_v44  ;;  %994 = vrot.lane.b32.xlu1 %v2001_v22, %s1851_s16  ;;  %v762_v1 = vmul.f32 %v2097_v29, %v2011_v32 }
 0x159   : > { %947 = vperm.xlu2 %1718, %v1910_v3   ;;  %v478_v14 = vpop.permute.xlu1 %477 }
 0x15a   : > { %v612_v51 = vpop.permute.xlu2 %611 }
 0x15b   : > { %v619_v37 = vsel %vm617_vm14, %v2288_v26, %v612_v51  ;;  %v623_v15 = vsel %vm617_vm14, %v612_v51, %v2288_v26  ;;  %1721 = vset.pattern.permute.xlu0 %v2887_v44  ;;  %v2888_v51 = vmov 12  }
 0x15c   : > { %v470_v39 = vpop.permute.xlu0 %469  ;;  %v648_v22 = vmul.f32 %v2117_v48, %v623_v15  ;;  %v649_v3 = vmul.f32 %v2117_v48, %v619_v37  ;;  %955 = vperm.xlu0 %1721, %v1924_v5   ;;  %v761_v48 = vmul.f32 %v2097_v29, %v2023_v31 }
 0x15d   : > { %v484_v25 = vsel %vm481_vm2, %v470_v39, %v478_v14  ;;  %v488_v12 = vsel %vm481_vm2, %v478_v14, %v470_v39  ;;  %v1853_v39 = vmov 1  }
 0x15e   : > { %v660_v26 = vmul.f32 %v2265_v30, %v648_v22  ;;  %v661_v44 = vmul.f32 %v2268_v60, %v649_v3 }
 0x160   : > { %v668_v53 = vadd.f32 %v660_v26, %v595_v42  ;;  %v669_v4 = vadd.f32 %v661_v44, %v596_v10  ;;  %951 = vperm.xlu1 %1717, %v1896_v0   ;;  %v516_v42 = vmul.f32 %v2103_v33, %v488_v12  ;;  %v517_v10 = vmul.f32 %v2103_v33, %v484_v25 }
 0x161   : > { %858 = vrot.lane.b32.xlu2 %v2143_v7, %s1847_s13  ;;  %v545_v5 = vpop.permute.xlu1 %544 }
 0x162   : > { %v737_v50 = vadd.f32 %v729_v23, %v668_v53  ;;  %v738_v2 = vadd.f32 %v730_v13, %v669_v4  ;;  %v786_v14 = vpop.permute.xlu2 %785  ;;  %1719 = vset.pattern.permute.xlu2 %v2888_v51  ;;  %v528_v26 = vmul.f32 %v2214_v54, %v516_v42  ;;  %v529_v44 = vmul.f32 %v2217_v56, %v517_v10 }
 0x163   : > { %v793_v0 = vsel %vm791_vm0, %v778_v46, %v786_v14  ;;  %v797_v37 = vsel %vm791_vm0, %v786_v14, %v778_v46  ;;  %v2432_v46 = vld [vmem:[%s2860_s3] sm:$0xff] }
 0x164   : > { %v537_v15 = vpop.permute.xlu0 %536  ;;  %v769_v31 = vadd.f32 %v761_v48, %v737_v50  ;;  %v770_v28 = vadd.f32 %v762_v1, %v738_v2  ;;  %v818_v29 = vmul.f32 %v2109_v41, %v793_v0  ;;  %v819_v58 = vmul.f32 %v2109_v41, %v797_v37  ;;  %1723 = vset.pattern.permute.xlu0 %v1853_v39 }
 0x165   : > { %v551_v22 = vsel %vm548_vm10, %v537_v15, %v545_v5  ;;  %v555_v33 = vsel %vm548_vm10, %v545_v5, %v537_v15  ;;  %1058 = vperm.xlu0 %1723, %v2432_v46  }
 0x166   : > { %v577_v3 = vmul.f32 %v2054_v59, %v555_v33  ;;  %v578_v41 = vmul.f32 %v2054_v59, %v551_v22  ;;  %v830_v25 = vmul.f32 %v2306_v47, %v818_v29  ;;  %v831_v12 = vmul.f32 %v2313_v36, %v819_v58 }
 0x168   : > { %v589_v23 = vmul.f32 %v2225_v62, %v577_v3  ;;  %v590_v13 = vmul.f32 %v2230_v63, %v578_v41  ;;  %v838_v53 = vadd.f32 %v830_v25, %v769_v31  ;;  %v839_v4 = vadd.f32 %v831_v12, %v770_v28  ;;  %923 = vrot.lane.b32.xlu1 %v2120_v49, %s1848_s14  ;;  %v2481_v12 = vld [vmem:[%s2860_s3 + $0x10] sm:$0xff] }
 0x169   : > { %986 = vrot.lane.b32.xlu2 %v1983_v6, %s1851_s16  ;;  %v606_v59 = vpop.permute.xlu1 %605  ;;  %1722 = vset.pattern.permute.xlu1 %v2888_v51 }
 0x16a   : > { %v597_v5 = vadd.f32 %v589_v23, %v528_v26  ;;  %v598_v48 = vadd.f32 %v590_v13, %v529_v44  ;;  %v855_v1 = vpop.permute.xlu2 %854 }
 0x16b   : > { %v862_v50 = vsel %vm860_vm8, %v2376_v27, %v855_v1  ;;  %v866_v2 = vsel %vm860_vm8, %v855_v1, %v2376_v27 }
 0x16c   : > { %v687_v14 = vpop.permute.xlu0 %686  ;;  %v891_v42 = vmul.f32 %v2165_v18, %v862_v50  ;;  %v892_v10 = vmul.f32 %v2165_v18, %v866_v2  ;;  %v763_v50 = vmul.f32 %v2169_v55, %v2079_v20  ;;  %v764_v2 = vmul.f32 %v2169_v55, %v2071_v17 }
 0x16e   : > { %v903_v6 = vmul.f32 %v2344_v40, %v891_v42  ;;  %v904_v51 = vmul.f32 %v2347_v43, %v892_v10 }
 0x170   : > { %v2458_v0 = vadd.f32 %v903_v6, %v838_v53  ;;  %v2460_v37 = vadd.f32 %v904_v51, %v839_v4  ;;  %990 = vrot.lane.b32.xlu1 %v2079_v20, %s1851_s16 }
 0x171   : > { %996 = vrot.lane.b32.xlu2 %v2011_v32, %s1851_s16  ;;  %v788_v27 = vpop.permute.xlu1 %787 }
 0x172   : > { %v614_v15 = vpop.permute.xlu2 %613 }
 0x173   : > { %v620_v31 = vsel %vm617_vm14, %v606_v59, %v614_v15  ;;  %v624_v18 = vsel %vm617_vm14, %v614_v15, %v606_v59 }
 0x174   : > { %v780_v28 = vpop.permute.xlu0 %779  ;;  %v650_v29 = vmul.f32 %v2132_v57, %v624_v18  ;;  %v651_v58 = vmul.f32 %v2132_v57, %v620_v31 }
 0x175   : > { %v794_v22 = vsel %vm791_vm0, %v780_v28, %v788_v27  ;;  %v798_v33 = vsel %vm791_vm0, %v788_v27, %v780_v28  ;;  %v2513_v28 = vld [vmem:[%s2860_s3 + $0x8] sm:$0xff] }
 0x176   : > { %v662_v32 = vmul.f32 %v2265_v30, %v650_v29  ;;  %v663_v3 = vmul.f32 %v2268_v60, %v651_v58  ;;  %v820_v59 = vmul.f32 %v2149_v11, %v794_v22 }
 0x178   : > { %v670_v41 = vadd.f32 %v662_v32, %v597_v5  ;;  %v671_v25 = vadd.f32 %v663_v3, %v598_v48  ;;  %1022 = vperm.xlu1 %1722, %v2481_v12   ;;  %v821_v5 = vmul.f32 %v2149_v11, %v798_v33  ;;  %v832_v11 = vmul.f32 %v2306_v47, %v820_v59 }
 0x179   : > { %1014 = vperm.xlu2 %1719, %v2432_v46   ;;  %v472_v57 = vpop.permute.xlu1 %471 }
 0x17a   : > { %v679_v26 = vpop.permute.xlu2 %678  ;;  %v833_v10 = vmul.f32 %v2313_v36, %v821_v5 }
 0x17b   : > { %v693_v44 = vsel %vm690_vm3, %v679_v26, %v687_v14  ;;  %v697_v23 = vsel %vm690_vm3, %v687_v14, %v679_v26 }
 0x17c   : > { %v608_v13 = vpop.permute.xlu0 %607  ;;  %v719_v53 = vmul.f32 %v2085_v21, %v697_v23  ;;  %v720_v4 = vmul.f32 %v2085_v21, %v693_v44  ;;  %v2889_v44 = vld [vmem:[#allocation2_spill] sm:$0xff] }
 0x17e   : > { %v731_v48 = vmul.f32 %v2281_v61, %v719_v53  ;;  %v732_v1 = vmul.f32 %v2286_v9, %v720_v4 }
 0x180   : > { %v739_v14 = vadd.f32 %v731_v48, %v670_v41  ;;  %v740_v42 = vadd.f32 %v732_v1, %v671_v25  ;;  %1000 = vrot.lane.b32.xlu1 %v2143_v7, %s1851_s16 }
 0x181   : > { %931 = vrot.lane.b32.xlu2 %v2143_v7, %s1848_s14  ;;  %v539_v21 = vpop.permute.xlu1 %538  ;;  %1724 = vset.pattern.permute.xlu1 %v1853_v39 }
 0x182   : > { %v771_v6 = vadd.f32 %v763_v50, %v739_v14  ;;  %v772_v20 = vadd.f32 %v764_v2, %v740_v42  ;;  %v480_v51 = vpop.permute.xlu2 %479  ;;  %v2890_v2 = vld [vmem:[#allocation3_spill] sm:$0xff] }
 0x183   : > { %v485_v55 = vsel %vm481_vm2, %v472_v57, %v480_v51  ;;  %v489_v27 = vsel %vm481_vm2, %v480_v51, %v472_v57  ;;  %vm933_vm2 = vcmp.lt.s32.totalorder %v2145_v8, 112 }
 0x184   : > { %v681_v15 = vpop.permute.xlu0 %680  ;;  %v840_v31 = vadd.f32 %v832_v11, %v771_v6  ;;  %v841_v18 = vadd.f32 %v833_v10, %v772_v20  ;;  %v518_v58 = vmul.f32 %v2074_v19, %v489_v27  ;;  %v519_v22 = vmul.f32 %v2074_v19, %v485_v55 }
 0x186   : > { %v530_v53 = vmul.f32 %v2214_v54, %v518_v58 }
 0x188   : > { %1062 = vperm.xlu1 %1724, %v2513_v28  }
 0x189   : > { %998 = vrot.lane.b32.xlu2 %v2071_v17, %s1851_s16  ;;  %v616_v29 = vpop.permute.xlu1 %615 }
 0x18a   : > { %v621_v33 = vsel %vm617_vm14, %v608_v13, %v616_v29  ;;  %v625_v32 = vsel %vm617_vm14, %v616_v29, %v608_v13  ;;  %v547_v3 = vpop.permute.xlu2 %546  ;;  %v531_v13 = vmul.f32 %v2217_v56, %v519_v22 }
 0x18b   : > { %v552_v41 = vsel %vm548_vm10, %v539_v21, %v547_v3  ;;  %v556_v25 = vsel %vm548_vm10, %v547_v3, %v539_v21  ;;  %v652_v17 = vmul.f32 %v2107_v38, %v625_v32  ;;  %v653_v26 = vmul.f32 %v2107_v38, %v621_v33  ;;  %v2541_v38 = vld [vmem:[%s2860_s3 + $0x18] sm:$0xff] }
 0x18c   : > { %v790_v57 = vpop.permute.xlu0 %789  ;;  %v579_v19 = vmul.f32 %v2889_v44, %v556_v25  ;;  %v580_v23 = vmul.f32 %v2889_v44, %v552_v41 }
 0x18d   : > { %v664_v5 = vmul.f32 %v2265_v30, %v652_v17  ;;  %v665_v48 = vmul.f32 %v2268_v60, %v653_v26 }
 0x18e   : > { %v591_v4 = vmul.f32 %v2225_v62, %v579_v19  ;;  %v592_v59 = vmul.f32 %v2230_v63, %v580_v23 }
 0x190   : > { %v599_v1 = vadd.f32 %v591_v4, %v530_v53  ;;  %v600_v50 = vadd.f32 %v592_v59, %v531_v13  ;;  %1070 = vperm.xlu1 %1724, %v2541_v38  }
 0x191   : > { %992 = vrot.lane.b32.xlu2 %v2120_v49, %s1851_s16  ;;  %v689_v54 = vpop.permute.xlu1 %688 }
 0x192   : > { %v694_v56 = vsel %vm690_vm3, %v681_v15, %v689_v54  ;;  %v698_v62 = vsel %vm690_vm3, %v689_v54, %v681_v15  ;;  %v782_v63 = vpop.permute.xlu2 %781  ;;  %v672_v30 = vadd.f32 %v664_v5, %v599_v1  ;;  %v673_v60 = vadd.f32 %v665_v48, %v600_v50 }
 0x193   : > { %v721_v14 = vmul.f32 %v2890_v2, %v698_v62  ;;  %v722_v42 = vmul.f32 %v2890_v2, %v694_v56  ;;  %v795_v21 = vsel %vm791_vm0, %v782_v63, %v790_v57  ;;  %v799_v11 = vsel %vm791_vm0, %v790_v57, %v782_v63 }
 0x194   : > { %v2556_v10 = vpop.permute.xlu0 %917  ;;  %vm1002_vm3 = vcmp.lt.s32.totalorder %v2145_v8, 111 }
 0x195   : > { %v733_v6 = vmul.f32 %v2281_v61, %v721_v14  ;;  %v734_v20 = vmul.f32 %v2286_v9, %v722_v42 }
 0x197   : > { %v741_v51 = vadd.f32 %v733_v6, %v672_v30  ;;  %v742_v55 = vadd.f32 %v734_v20, %v673_v60 }
 0x199   : > { %1026 = vperm.xlu2 %1719, %v2541_v38   ;;  %v849_v27 = vpop.permute.xlu1 %848 }
 0x19a   : > { %v857_v15 = vpop.permute.xlu2 %856 }
 0x19b   : > { %v863_v29 = vsel %vm860_vm8, %v849_v27, %v857_v15  ;;  %v867_v58 = vsel %vm860_vm8, %v857_v15, %v849_v27 }
 0x19c   : > { %v928_v22 = vpop.permute.xlu0 %927 }
 0x1a1   : > { %1725 = vset.pattern.permute.xlu2 %v1853_v39  ;;  %v920_v61 = vpop.permute.xlu1 %919 }
 0x1a2   : > { %v935_v9 = vsel %vm933_vm2, %v920_v61, %v928_v22  ;;  %v939_v33 = vsel %vm933_vm2, %v928_v22, %v920_v61  ;;  %1066 = vperm.xlu2 %1725, %v2481_v12   ;;  %v926_v32 = vpop.permute.xlu2 %925 }
 0x1a4   : > { %v883_v3 = vpop.permute.xlu0 %882 }
 0x1a5   : > { %v893_v41 = vmul.f32 %v883_v3, %v863_v29  ;;  %v894_v25 = vmul.f32 %v883_v3, %v867_v58 }
 0x1a7   : > { %v905_v57 = vmul.f32 %v2344_v40, %v893_v41  ;;  %v906_v17 = vmul.f32 %v2347_v43, %v894_v25 }
 0x1a9   : > { %v2574_v26 = vadd.f32 %v905_v57, %v840_v31  ;;  %v2576_v39 = vadd.f32 %v906_v17, %v841_v18  ;;  %v757_v44 = vpop.permute.xlu1 %756  ;;  %v2585_v18 = vsel %vm869_vm1, 1.0, %v2886_v52 }
 0x1aa   : > { %v765_v19 = vmul.f32 %v757_v44, %v2120_v49  ;;  %v766_v23 = vmul.f32 %v757_v44, %v2143_v7  ;;  %v814_v53 = vpop.permute.xlu2 %813  ;;  %v2590_v49 = vsel %vm870_vm4, 1.0, %v2886_v52 }
 0x1ab   : > { %v822_v13 = vmul.f32 %v814_v53, %v795_v21  ;;  %v823_v4 = vmul.f32 %v814_v53, %v799_v11 }
 0x1ac   : > { %v922_v59 = vpop.permute.xlu0 %921  ;;  %v773_v5 = vadd.f32 %v765_v19, %v741_v51  ;;  %v774_v48 = vadd.f32 %v766_v23, %v742_v55 }
 0x1ad   : > { %v834_v1 = vmul.f32 %v2306_v47, %v822_v13  ;;  %v835_v50 = vmul.f32 %v2313_v36, %v823_v4  ;;  %v2640_v4 = vsel %vm1011_vm5, 1.0, %v2886_v52 }
 0x1af   : > { %v842_v54 = vadd.f32 %v834_v1, %v773_v5  ;;  %v843_v31 = vadd.f32 %v835_v50, %v774_v48 }
 0x1b2   : > { %v944_v56 = vpop.permute.xlu1 %943 }
 0x1b3   : > { %v948_v7 = vpop.permute.xlu2 %947 }
 0x1b4   : > { %v2592_v62 = vpop.permute.xlu0 %988  ;;  %v960_v63 = vmul.f32 %v948_v7, %v935_v9  ;;  %v961_v47 = vmul.f32 %v948_v7, %v939_v33  ;;  %v934_v9 = vsel %vm933_vm2, %v2556_v10, %v926_v32  ;;  %v938_v33 = vsel %vm933_vm2, %v926_v32, %v2556_v10 }
 0x1b5   : > { %v959_v3 = vmul.f32 %v944_v56, %v938_v33 }
 0x1b6   : > { %v972_v36 = vmul.f32 %v2585_v18, %v960_v63  ;;  %v973_v30 = vmul.f32 %v2590_v49, %v961_v47 }
 0x1b7   : > { %v971_v25 = vmul.f32 %v2590_v49, %v959_v3 }
 0x1b8   : > { %v2597_v60 = vadd.f32 %v972_v36, %v2458_v0  ;;  %v2600_v2 = vadd.f32 %v973_v30, %v2460_v37 }
 0x1ba   : > { %v851_v14 = vpop.permute.xlu1 %850 }
 0x1bb   : > { %v859_v42 = vpop.permute.xlu2 %858 }
 0x1bc   : > { %v864_v21 = vsel %vm860_vm8, %v851_v14, %v859_v42  ;;  %v868_v11 = vsel %vm860_vm8, %v859_v42, %v851_v14  ;;  %v887_v6 = vpop.permute.xlu0 %886 }
 0x1bd   : > { %v895_v20 = vmul.f32 %v887_v6, %v864_v21  ;;  %v896_v51 = vmul.f32 %v887_v6, %v868_v11 }
 0x1bf   : > { %v907_v55 = vmul.f32 %v2344_v40, %v895_v20  ;;  %v908_v27 = vmul.f32 %v2347_v43, %v896_v51  ;;  %v958_v40 = vmul.f32 %v944_v56, %v934_v9 }
 0x1c1   : > { %v2608_v0 = vadd.f32 %v907_v55, %v842_v54  ;;  %v2610_v15 = vadd.f32 %v908_v27, %v843_v31  ;;  %v970_v41 = vmul.f32 %v2585_v18, %v958_v40  ;;  %v979_v54 = vadd.f32 %v971_v25, %v2359_v34 }
 0x1c2   : > { %v930_v37 = vpop.permute.xlu1 %929 }
 0x1c3   : > { %v987_v29 = vpop.permute.xlu2 %986  ;;  %v936_v57 = vsel %vm933_vm2, %v922_v59, %v930_v37  ;;  %v940_v10 = vsel %vm933_vm2, %v930_v37, %v922_v59  ;;  %v2643_v59 = vsel %vm1012_vm7, 1.0, %v2886_v52  ;;  %v978_v50 = vadd.f32 %v970_v41, %v2357_v45 }
 0x1c5   : > { %v1019_v58 = vpop.permute.xlu0 %1018 }
 0x1ca   : > { %v995_v22 = vpop.permute.xlu1 %994 }
 0x1cb   : > { %v997_v61 = vpop.permute.xlu2 %996  ;;  %v1003_v24 = vsel %vm1002_vm3, %v987_v29, %v995_v22  ;;  %v1007_v16 = vsel %vm1002_vm3, %v995_v22, %v987_v29 }
 0x1cc   : > { %v1004_v20 = vsel %vm1002_vm3, %v2592_v62, %v997_v61  ;;  %v1008_v51 = vsel %vm1002_vm3, %v997_v61, %v2592_v62 }
 0x1cd   : > { %v1031_v27 = vmul.f32 %v1019_v58, %v1004_v20  ;;  %v1032_v37 = vmul.f32 %v1019_v58, %v1008_v51 }
 0x1ce   : > { %v2618_v43 = vpop.permute.xlu0 %955 }
 0x1cf   : > { %v1043_v40 = vmul.f32 %v2640_v4, %v1031_v27  ;;  %v1044_v3 = vmul.f32 %v2643_v59, %v1032_v37 }
 0x1d2   : > { %v952_v17 = vpop.permute.xlu1 %951 }
 0x1d3   : > { %v962_v44 = vmul.f32 %v952_v17, %v936_v57  ;;  %v963_v19 = vmul.f32 %v952_v17, %v940_v10  ;;  %v1015_v23 = vpop.permute.xlu2 %1014 }
 0x1d4   : > { %v1029_v53 = vmul.f32 %v1015_v23, %v1003_v24  ;;  %v1030_v13 = vmul.f32 %v1015_v23, %v1007_v16 }
 0x1d5   : > { %v974_v35 = vmul.f32 %v2585_v18, %v962_v44  ;;  %v975_v5 = vmul.f32 %v2590_v49, %v963_v19 }
 0x1d6   : > { %v1041_v48 = vmul.f32 %v2640_v4, %v1029_v53  ;;  %v1042_v1 = vmul.f32 %v2643_v59, %v1030_v13 }
 0x1d7   : > { %v1059_v31 = vpop.permute.xlu0 %1058  ;;  %v2652_v56 = vadd.f32 %v974_v35, %v2574_v26  ;;  %v2655_v7 = vadd.f32 %v975_v5, %v2576_v39 }
 0x1d8   : > { %v1049_v52 = vadd.f32 %v1041_v48, %v978_v50  ;;  %v1050_v63 = vadd.f32 %v1042_v1, %v979_v54 }
 0x1da   : > { %v2657_v47 = vadd.f32 %v1059_v31, %v1049_v52  ;;  %v2659_v36 = vadd.f32 %v1059_v31, %v1050_v63  ;;  %v924_v30 = vpop.permute.xlu1 %923 }
 0x1db   : > { %v932_v14 = vpop.permute.xlu2 %931 }
 0x1dc   : > { %v1640_v42 = vmul.f32 -1.442695, %v2657_v47  ;;  %v1641_v45 = vmul.f32 -1.442695, %v2659_v36  ;;  %v937_v25 = vsel %vm933_vm2, %v924_v30, %v932_v14  ;;  %v941_v23 = vsel %vm933_vm2, %v932_v14, %v924_v30 }
 0x1dd   : > { %v964_v5 = vmul.f32 %v2618_v43, %v937_v25 }
 0x1de   : > { %1763 = vpow2.f32 %v1640_v42 }
 0x1df   : > { %1765 = vpow2.f32 %v1641_v45  ;;  %v976_v51 = vmul.f32 %v2585_v18, %v964_v5 }
 0x1e2   : > { %v991_v34 = vpop.permute.xlu1 %990 }
 0x1e3   : > { %v999_v26 = vpop.permute.xlu2 %998 }
 0x1e4   : > { %v1764_v21 = vpop.eup %1763  ;;  %v1005_v57 = vsel %vm1002_vm3, %v991_v34, %v999_v26  ;;  %v1009_v62 = vsel %vm1002_vm3, %v999_v26, %v991_v34  ;;  %v965_v34 = vmul.f32 %v2618_v43, %v941_v23 }
 0x1e5   : > { %v1766_v11 = vpop.eup %1765  ;;  %v1105_v39 = vadd.f32 1.0, %v1764_v21 }
 0x1e6   : > { %v1106_v6 = vadd.f32 1.0, %v1766_v11 }
 0x1e7   : > { %1767 = vrcp.f32 %v1105_v39  ;;  %v1122_v58 = vand.u32 2147483647, %v1105_v39  ;;  %v1124_v10 = vand.u32 2147483648, %v1105_v39  ;;  %vm1118_vm12 = vweird.f32 %v1105_v39 }
 0x1e8   : > { %1769 = vrcp.f32 %v1106_v6  ;;  %v1137_v17 = vand.u32 2147483647, %v1106_v6  ;;  %v1139_v19 = vand.u32 2147483648, %v1106_v6  ;;  %vm1133_vm13 = vweird.f32 %v1106_v6 }
 0x1e9   : > { %vm1123_vm15 = vcmp.eq.f32.partialorder %v1122_v58, 8.507059e+37  ;;  %v1125_v50 = vor.u32 1.1754944e-38, %v1124_v10 }
 0x1ea   : > { %v1023_v55 = vpop.permute.xlu1 %1022  ;;  %vm1138_vm1 = vcmp.eq.f32.partialorder %v1137_v17, 8.507059e+37  ;;  %v1140_v63 = vor.u32 1.1754944e-38, %v1139_v19 }
 0x1eb   : > { %v993_v29 = vpop.permute.xlu2 %992  ;;  %v1033_v24 = vmul.f32 %v1023_v55, %v1005_v57  ;;  %v1034_v53 = vmul.f32 %v1023_v55, %v1009_v62 }
 0x1ed   : > { %v1768_v22 = vpop.eup %1767  ;;  %v1045_v31 = vmul.f32 %v2640_v4, %v1033_v24  ;;  %v1046_v30 = vmul.f32 %v2643_v59, %v1034_v53 }
 0x1ee   : > { %v1770_v9 = vpop.eup %1769  ;;  %v1114_v33 = vmul.f32 %v1768_v22, %v1105_v39  ;;  %vm1119_vm10 = vweird.f32 %v1768_v22  ;;  %v1051_v39 = vadd.f32 %v1043_v40, %v2597_v60 }
 0x1ef   : > { %v1129_v41 = vmul.f32 %v1770_v9, %v1106_v6  ;;  %vm1134_vm11 = vweird.f32 %v1770_v9  ;;  %vm1120_vm14 = vmor %vm1118_vm12, %vm1119_vm10  ;;  %v1052_v6 = vadd.f32 %v1044_v3, %v2600_v2  ;;  %v1053_v27 = vadd.f32 %v1045_v31, %v2652_v56 }
 0x1f0   : > { %v1115_v61 = vsub.f32 1.0, %v1114_v33  ;;  %vm1135_vm0 = vmor %vm1133_vm13, %vm1134_vm11  ;;  %v977_v2 = vmul.f32 %v2590_v49, %v965_v34  ;;  %v984_v49 = vadd.f32 %v976_v51, %v2608_v0 }
 0x1f1   : > { %v1130_v32 = vsub.f32 1.0, %v1129_v41 }
 0x1f2   : > { %v1001_v16 = vpop.permute.xlu1 %1000  ;;  %v1116_v44 = vmul.f32 %v1768_v22, %v1115_v61 }
 0x1f3   : > { %v1027_v13 = vpop.permute.xlu2 %1026  ;;  %v1131_v35 = vmul.f32 %v1770_v9, %v1130_v32  ;;  %v1006_v1 = vsel %vm1002_vm3, %v993_v29, %v1001_v16  ;;  %v1010_v14 = vsel %vm1002_vm3, %v1001_v16, %v993_v29 }
 0x1f4   : > { %v1117_v48 = vadd.f32 %v1768_v22, %v1116_v44  ;;  %v1035_v26 = vmul.f32 %v1027_v13, %v1006_v1  ;;  %v1036_v8 = vmul.f32 %v1027_v13, %v1010_v14 }
 0x1f5   : > { %v1132_v54 = vadd.f32 %v1770_v9, %v1131_v35 }
 0x1f6   : > { %v1121_v52 = vsel %vm1120_vm14, %v1768_v22, %v1117_v48  ;;  %v1048_v33 = vmul.f32 %v2643_v59, %v1036_v8 }
 0x1f7   : > { %v1126_v42 = vsel %vm1123_vm15, %v1125_v50, %v1121_v52  ;;  %v1136_v45 = vsel %vm1135_vm0, %v1770_v9, %v1132_v54 }
 0x1f8   : > { %v1141_v21 = vsel %vm1138_vm1, %v1140_v63, %v1136_v45  ;;  %v2688_v11 = vmul.f32 %v1126_v42, %v2657_v47  ;;  %v1054_v47 = vadd.f32 %v1046_v30, %v2655_v7 }
 0x1f9   : > { %v2693_v20 = vmul.f32 %v1141_v21, %v2659_v36  ;;  %v1047_v36 = vmul.f32 %v2640_v4, %v1035_v26  ;;  %v985_v4 = vadd.f32 %v977_v2, %v2610_v15 }
 0x1fa   : > { %v1063_v55 = vpop.permute.xlu1 %1062 }
 0x1fb   : > { %v2697_v37 = vadd.f32 %v1063_v55, %v1051_v39  ;;  %v2699_v43 = vadd.f32 %v1063_v55, %v1052_v6  ;;  %v1241_v60 = vadd.f32 %v2693_v20, %v2688_v11  ;;  %v1055_v3 = vadd.f32 %v1047_v36, %v984_v49 }
 0x1fc   : > { %v1067_v29 = vpop.permute.xlu2 %1066  ;;  %v1056_v25 = vadd.f32 %v1048_v33, %v985_v4 }
 0x1fd   : > { %v1642_v18 = vmul.f32 -1.442695, %v2697_v37  ;;  %v1643_v22 = vmul.f32 -1.442695, %v2699_v43  ;;  %v2708_v9 = vadd.f32 %v1067_v29, %v1053_v27  ;;  %v2710_v56 = vadd.f32 %v1067_v29, %v1054_v47  ;;  %1242 = vadd.xlane.f32.xlu2 %v1241_v60 }
 0x1ff   : > { %1771 = vpow2.f32 %v1642_v18  ;;  %v1644_v7 = vmul.f32 -1.442695, %v2708_v9  ;;  %v1645_v40 = vmul.f32 -1.442695, %v2710_v56 }
 0x200   : > { %1773 = vpow2.f32 %v1643_v22 }
 0x201   : > { %1775 = vpow2.f32 %v1644_v7 }
 0x202   : > { %1777 = vpow2.f32 %v1645_v40  ;;  %v1071_v41 = vpop.permute.xlu1 %1070 }
 0x203   : > { %v2717_v57 = vadd.f32 %v1071_v41, %v1055_v3  ;;  %v2719_v62 = vadd.f32 %v1071_v41, %v1056_v25 }
 0x205   : > { %v1772_v59 = vpop.eup %1771  ;;  %v1646_v61 = vmul.f32 -1.442695, %v2717_v57  ;;  %v1647_v24 = vmul.f32 -1.442695, %v2719_v62 }
 0x206   : > { %v1774_v58 = vpop.eup %1773  ;;  %v1107_v10 = vadd.f32 1.0, %v1772_v59 }
 0x207   : > { %v1776_v32 = vpop.eup %1775  ;;  %v1108_v17 = vadd.f32 1.0, %v1774_v58  ;;  %1779 = vpow2.f32 %v1646_v61 }
 0x208   : > { %v1778_v0 = vpop.eup %1777  ;;  %1781 = vrcp.f32 %v1107_v10  ;;  %v2722_v15 = vadd.f32 1.0, %v1776_v32  ;;  %v1152_v44 = vand.u32 2147483647, %v1107_v10  ;;  %v1154_v19 = vand.u32 2147483648, %v1107_v10 }
 0x209   : > { %1783 = vrcp.f32 %v1108_v17  ;;  %v2725_v16 = vadd.f32 1.0, %v1778_v0  ;;  %v1167_v23 = vand.u32 2147483647, %v1108_v17  ;;  %v1169_v53 = vand.u32 2147483648, %v1108_v17 }
 0x20a   : > { %1785 = vrcp.f32 %v2722_v15  ;;  %v1182_v35 = vand.u32 2147483647, %v2722_v15  ;;  %vm1148_vm4 = vweird.f32 %v1107_v10  ;;  %vm1163_vm6 = vweird.f32 %v1108_v17 }
 0x20b   : > { %1787 = vrcp.f32 %v2725_v16  ;;  %vm2732_vm8 = vcmp.eq.f32.partialorder %v1152_v44, 8.507059e+37  ;;  %v1155_v31 = vor.u32 1.1754944e-38, %v1154_v19  ;;  %vm1178_vm9 = vweird.f32 %v2722_v15 }
 0x20c   : > { %1789 = vpow2.f32 %v1647_v24  ;;  %vm2738_vm2 = vcmp.eq.f32.partialorder %v1167_v23, 8.507059e+37  ;;  %v1170_v14 = vor.u32 1.1754944e-38, %v1169_v53  ;;  %vm2743_vm3 = vcmp.eq.f32.partialorder %v1182_v35, 8.507059e+37 }
 0x20d   : > { %v1780_v13 = vpop.eup %1779  ;;  %v1184_v21 = vand.u32 2147483648, %v2722_v15  ;;  %vm1193_vm5 = vweird.f32 %v2725_v16  ;;  %v1197_v8 = vand.u32 2147483647, %v2725_v16  ;;  %v1199_v36 = vand.u32 2147483648, %v2725_v16 }
 0x20e   : > { %v1782_v5 = vpop.eup %1781  ;;  %v2730_v48 = vadd.f32 1.0, %v1780_v13 }
 0x20f   : > { %v1784_v1 = vpop.eup %1783  ;;  %v1144_v50 = vmul.f32 %v1782_v5, %v1107_v10  ;;  %vm1149_vm7 = vweird.f32 %v1782_v5  ;;  %v1185_v7 = vor.u32 1.1754944e-38, %v1184_v21  ;;  %vm2757_vm15 = vcmp.eq.f32.partialorder %v1197_v8, 8.507059e+37 }
 0x210   : > { %v1786_v52 = vpop.eup %1785  ;;  %1791 = vrcp.f32 %v2730_v48  ;;  %v1159_v63 = vmul.f32 %v1784_v1, %v1108_v17  ;;  %vm1164_vm10 = vweird.f32 %v1784_v1  ;;  %vm1150_vm12 = vmor %vm1148_vm4, %vm1149_vm7  ;;  %v1200_v58 = vor.u32 1.1754944e-38, %v1199_v36 }
 0x211   : > { %v1788_v42 = vpop.eup %1787  ;;  %v1145_v45 = vsub.f32 1.0, %v1144_v50  ;;  %v1174_v34 = vmul.f32 %v1786_v52, %v2722_v15  ;;  %vm1179_vm11 = vweird.f32 %v1786_v52  ;;  %vm1165_vm14 = vmor %vm1163_vm6, %vm1164_vm10  ;;  %v1214_v19 = vand.u32 2147483648, %v2730_v48 }
 0x212   : > { %v1790_v39 = vpop.eup %1789  ;;  %v1160_v6 = vsub.f32 1.0, %v1159_v63  ;;  %v1189_v51 = vmul.f32 %v1788_v42, %v2725_v16  ;;  %vm1194_vm13 = vweird.f32 %v1788_v42  ;;  %vm1180_vm0 = vmor %vm1178_vm9, %vm1179_vm11  ;;  %v1212_v35 = vand.u32 2147483647, %v2730_v48 }
 0x213   : > { %v2751_v55 = vadd.f32 1.0, %v1790_v39  ;;  %v1146_v27 = vmul.f32 %v1782_v5, %v1145_v45  ;;  %v1175_v47 = vsub.f32 1.0, %v1174_v34  ;;  %vm1195_vm1 = vmor %vm1193_vm5, %vm1194_vm13  ;;  %vm1208_vm6 = vweird.f32 %v2730_v48 }
 0x214   : > { %v1161_v60 = vmul.f32 %v1784_v1, %v1160_v6  ;;  %v1190_v2 = vsub.f32 1.0, %v1189_v51  ;;  %vm1213_vm9 = vcmp.eq.f32.partialorder %v1212_v35, 8.507059e+37  ;;  %vm1261_vm10 = vcmask 113768  }
 0x215   : > { %1793 = vrcp.f32 %v2751_v55  ;;  %v1147_v29 = vadd.f32 %v1782_v5, %v1146_v27  ;;  %v1176_v18 = vmul.f32 %v1786_v52, %v1175_v47  ;;  %v1227_v63 = vand.u32 2147483647, %v2751_v55 }
 0x216   : > { %v1792_v22 = vpop.eup %1791  ;;  %v1162_v33 = vadd.f32 %v1784_v1, %v1161_v60  ;;  %v1191_v40 = vmul.f32 %v1788_v42, %v1190_v2  ;;  %vm1328_vm11 = vcmask 121968  }
 0x217   : > { %v1151_v49 = vsel %vm1150_vm12, %v1782_v5, %v1147_v29  ;;  %v1177_v4 = vadd.f32 %v1786_v52, %v1176_v18  ;;  %v1204_v41 = vmul.f32 %v1792_v22, %v2730_v48  ;;  %vm1209_vm4 = vweird.f32 %v1792_v22 }
 0x218   : > { %v1156_v25 = vsel %vm2732_vm8, %v1155_v31, %v1151_v49  ;;  %v1166_v59 = vsel %vm1165_vm14, %v1784_v1, %v1162_v33  ;;  %v1192_v61 = vadd.f32 %v1788_v42, %v1191_v40  ;;  %vm1210_vm8 = vmor %vm1208_vm6, %vm1209_vm4  ;;  %v1215_v31 = vor.u32 1.1754944e-38, %v1214_v19 }
 0x219   : > { %v1171_v10 = vsel %vm2738_vm2, %v1170_v14, %v1166_v59  ;;  %v2769_v32 = vmul.f32 %v1156_v25, %v2697_v37  ;;  %v1181_v17 = vsel %vm1180_vm0, %v1786_v52, %v1177_v4  ;;  %v1205_v0 = vsub.f32 1.0, %v1204_v41 }
 0x21a   : > { %v2774_v24 = vmul.f32 %v1171_v10, %v2699_v43  ;;  %v1186_v15 = vsel %vm2743_vm3, %v1185_v7, %v1181_v17  ;;  %v1196_v44 = vsel %vm1195_vm1, %v1788_v42, %v1192_v61  ;;  %v1229_v52 = vand.u32 2147483648, %v2751_v55 }
 0x21b   : > { %v1794_v23 = vpop.eup %1793  ;;  %v1201_v53 = vsel %vm2757_vm15, %v1200_v58, %v1196_v44  ;;  %v2782_v37 = vmul.f32 %v1186_v15, %v2708_v9  ;;  %v1206_v13 = vmul.f32 %v1792_v22, %v1205_v0  ;;  %vm1223_vm3 = vweird.f32 %v2751_v55 }
 0x21c   : > { %v1244_v16 = vadd.f32 %v2774_v24, %v2769_v32  ;;  %v2787_v43 = vmul.f32 %v1201_v53, %v2710_v56  ;;  %v1219_v5 = vmul.f32 %v1794_v23, %v2751_v55  ;;  %vm1224_vm2 = vweird.f32 %v1794_v23 }
 0x21d   : > { %v1207_v1 = vadd.f32 %v1792_v22, %v1206_v13  ;;  %vm1225_vm5 = vmor %vm1223_vm3, %vm1224_vm2  ;;  %v1230_v48 = vor.u32 1.1754944e-38, %v1229_v52  ;;  %vm1228_vm7 = vcmp.eq.f32.partialorder %v1227_v63, 8.507059e+37 }
 0x21e   : > { %1245 = vadd.xlane.f32.xlu0 %v1244_v16  ;;  %v1247_v9 = vadd.f32 %v2787_v43, %v2782_v37  ;;  %v1220_v50 = vsub.f32 1.0, %v1219_v5 }
 0x21f   : > { %v1211_v54 = vsel %vm1210_vm8, %v1792_v22, %v1207_v1 }
 0x220   : > { %1248 = vadd.xlane.f32.xlu1 %v1247_v9  ;;  %v1221_v56 = vmul.f32 %v1794_v23, %v1220_v50  ;;  %v1216_v30 = vsel %vm1213_vm9, %v1215_v31, %v1211_v54 }
 0x221   : > { %v2798_v45 = vmul.f32 %v1216_v30, %v2717_v57 }
 0x222   : > { %v1222_v14 = vadd.f32 %v1794_v23, %v1221_v56 }
 0x224   : > { %v1226_v42 = vsel %vm1225_vm5, %v1794_v23, %v1222_v14 }
 0x225   : > { %v1231_v34 = vsel %vm1228_vm7, %v1230_v48, %v1226_v42 }
 0x226   : > { %v2801_v26 = vmul.f32 %v1231_v34, %v2719_v62 }
 0x228   : > { %v1250_v21 = vadd.f32 %v2801_v26, %v2798_v45 }
 0x22a   : > { %1251 = vadd.xlane.f32.xlu2 %v1250_v21 }
 0x242   : > { %1275 = vrot.lane.b32.xlu2 %v2432_v46, %s1854_s28 }
 0x270   : > { %v1243_v39 = vpop.xlane.xlu2 %1242 }
 0x271   : > { %v1253_v55 = vmul.f32 0.00390625, %v1243_v39 }
 0x273   : > { %v1257_v47 = vmul.f32 %v2432_v46, %v1253_v55 }
 0x275   : > { %v1262_v36 = vsel %vm1261_vm10, %v1257_v47, 0.0  ;;  %v1329_v29 = vsel %vm1328_vm11, %v1257_v47, 0.0 }
 0x291   : > { %v1246_v6 = vpop.xlane.xlu0 %1245 }
 0x292   : > { %v1254_v51 = vmul.f32 0.00390625, %v1246_v6 }
 0x293   : > { %v1249_v8 = vpop.xlane.xlu1 %1248 }
 0x294   : > { %v1258_v27 = vmul.f32 %v2513_v28, %v1254_v51  ;;  %v1255_v57 = vmul.f32 0.00390625, %v1249_v8 }
 0x296   : > { %v1263_v62 = vsel %vm1261_vm10, %v1258_v27, 0.0  ;;  %v1330_v60 = vsel %vm1328_vm11, %v1258_v27, 0.0  ;;  %v1259_v2 = vmul.f32 %v2481_v12, %v1255_v57 }
 0x297   : > { %v1264_v18 = vadd.f32 %v1263_v62, %v1262_v36  ;;  %v1331_v22 = vadd.f32 %v1330_v60, %v1329_v29 }
 0x298   : > { %v1265_v7 = vsel %vm1261_vm10, %v1259_v2, 0.0  ;;  %v1332_v40 = vsel %vm1328_vm11, %v1259_v2, 0.0 }
 0x299   : > { %v1266_v4 = vadd.f32 %v1265_v7, %v1264_v18  ;;  %v1333_v3 = vadd.f32 %v1332_v40, %v1331_v22 }
 0x29d   : > { %v1252_v33 = vpop.xlane.xlu2 %1251 }
 0x29e   : > { %v1256_v46 = vmul.f32 0.00390625, %v1252_v33 }
 0x2a0   : > { %v1260_v49 = vmul.f32 %v2541_v38, %v1256_v46 }
 0x2a2   : > { %v1267_v41 = vsel %vm1261_vm10, %v1260_v49, 0.0  ;;  %v1334_v25 = vsel %vm1328_vm11, %v1260_v49, 0.0 }
 0x2a3   : > { %v1268_v59 = vadd.f32 %v1267_v41, %v1266_v4  ;;  %v1335_v61 = vadd.f32 %v1334_v25, %v1333_v3  ;;  %v2824_v25 = vld [vmem:[%s2860_s3] sm:$0xff] }
 0x2a5   : > { %v1269_v58 = vrot.slane %v1268_v59, 4  ;;  %v1336_v10 = vrot.slane %v1335_v61, 4  ;;  %v1276_v16 = vpop.permute.xlu2 %1275 }
 0x2a7   : > { %v1270_v17 = vadd.f32 %v1269_v58, %v1268_v59  ;;  %v1337_v0 = vadd.f32 %v1336_v10, %v1335_v61 }
 0x2a9   : > { %v1271_v15 = vrot.slane %v1270_v17, 2  ;;  %v1338_v44 = vrot.slane %v1337_v0, 2 }
 0x2ab   : > { %v1272_v19 = vadd.f32 %v1271_v15, %v1270_v17  ;;  %v1339_v23 = vadd.f32 %v1338_v44, %v1337_v0  ;;  %v1858_v15 = vmov 3  }
 0x2ac   : > { %1726 = vset.pattern.permute.xlu1 %v1858_v15  ;;  %1727 = vset.pattern.permute.xlu0 %v1858_v15 }
 0x2ad   : > { %v1273_v53 = vrot.slane %v1272_v19, 1  ;;  %v1340_v13 = vrot.slane %v1339_v23, 1  ;;  %1728 = vset.pattern.permute.xlu2 %v1858_v15 }
 0x2af   : > { %v1274_v35 = vadd.f32 %v1273_v53, %v1272_v19  ;;  %v1341_v5 = vadd.f32 %v1340_v13, %v1339_v23 }
 0x2b1   : > { %v1278_v1 = vadd.f32 %v1276_v16, %v1274_v35  ;;  %v1342_v9 = vadd.f32 %v1341_v5, %v1276_v16 }
 0x2b3   : > { %v1648_v50 = vmul.f32 -1.442695, %v1278_v1  ;;  %v1649_v54 = vmul.f32 -1.442695, %v1342_v9 }
 0x2b5   : > { %1795 = vpow2.f32 %v1648_v50 }
 0x2b6   : > { %1797 = vpow2.f32 %v1649_v54 }
 0x2bb   : > { %v1796_v31 = vpop.eup %1795 }
 0x2bc   : > { %v1798_v52 = vpop.eup %1797  ;;  %v1282_v56 = vadd.f32 1.0, %v1796_v31 }
 0x2bd   : > { %v1346_v63 = vadd.f32 1.0, %v1798_v52 }
 0x2be   : > { %1799 = vrcp.f32 %v1282_v56  ;;  %v1294_v21 = vand.u32 2147483648, %v1282_v56  ;;  %v1292_v51 = vand.u32 2147483647, %v1282_v56  ;;  %vm1288_vm14 = vweird.f32 %v1282_v56 }
 0x2bf   : > { %1801 = vrcp.f32 %v1346_v63  ;;  %v1358_v8 = vand.u32 2147483648, %v1346_v63  ;;  %v1356_v27 = vand.u32 2147483647, %v1346_v63  ;;  %vm1352_vm0 = vweird.f32 %v1346_v63 }
 0x2c0   : > { %v1295_v47 = vor.u32 1.1754944e-38, %v1294_v21  ;;  %vm1293_vm1 = vcmp.eq.f32.partialorder %v1292_v51, 8.507059e+37 }
 0x2c1   : > { %v1359_v2 = vor.u32 1.1754944e-38, %v1358_v8  ;;  %vm1357_vm6 = vcmp.eq.f32.partialorder %v1356_v27, 8.507059e+37 }
 0x2c4   : > { %v1800_v30 = vpop.eup %1799 }
 0x2c5   : > { %v1802_v14 = vpop.eup %1801  ;;  %v1284_v48 = vmul.f32 %v1800_v30, %v1282_v56  ;;  %vm1289_vm12 = vweird.f32 %v1800_v30 }
 0x2c6   : > { %v1348_v42 = vmul.f32 %v1802_v14, %v1346_v63  ;;  %vm1353_vm13 = vweird.f32 %v1802_v14  ;;  %vm1290_vm15 = vmor %vm1288_vm14, %vm1289_vm12 }
 0x2c7   : > { %v1285_v34 = vsub.f32 1.0, %v1284_v48  ;;  %vm1354_vm4 = vmor %vm1352_vm0, %vm1353_vm13 }
 0x2c8   : > { %v1349_v39 = vsub.f32 1.0, %v1348_v42 }
 0x2c9   : > { %v1286_v6 = vmul.f32 %v1800_v30, %v1285_v34 }
 0x2ca   : > { %v1350_v55 = vmul.f32 %v1802_v14, %v1349_v39 }
 0x2cb   : > { %v1287_v57 = vadd.f32 %v1800_v30, %v1286_v6 }
 0x2cc   : > { %v1351_v62 = vadd.f32 %v1802_v14, %v1350_v55 }
 0x2cd   : > { %v1291_v60 = vsel %vm1290_vm15, %v1800_v30, %v1287_v57 }
 0x2ce   : > { %v1296_v36 = vsel %vm1293_vm1, %v1295_v47, %v1291_v60  ;;  %v1355_v29 = vsel %vm1354_vm4, %v1802_v14, %v1351_v62 }
 0x2cf   : > { %v1298_v18 = vmul.f32 %v1296_v36, %v1278_v1  ;;  %v1360_v22 = vsel %vm1357_vm6, %v1359_v2, %v1355_v29 }
 0x2d0   : > { %v1362_v33 = vmul.f32 %v1360_v22, %v1342_v9 }
 0x2d1   : > { %v1299_v7 = vperm.slane %v1298_v18, 0 }
 0x2d2   : > { %v1363_v40 = vperm.slane %v1362_v33, 0 }
 0x2d3   : > { %1301 = vrot.lane.b32.xlu0 %v1299_v7, %s1855_s29 }
 0x2d4   : > { %1365 = vrot.lane.b32.xlu1 %v1363_v40, %s1855_s29 }
 0x345   : > { %v1302_v46 = vpop.permute.xlu0 %1301 }
 0x346   : > { %v1366_v49 = vpop.permute.xlu1 %1365  ;;  %v1307_v4 = vmul.f32 %v2541_v38, %v1302_v46  ;;  %v1306_v3 = vmul.f32 %v2481_v12, %v1302_v46  ;;  %v1304_v59 = vmul.f32 %v2824_v25, %v1302_v46  ;;  %v1305_v58 = vmul.f32 %v2513_v28, %v1302_v46 }
 0x347   : > { %v1370_v41 = vmul.f32 %v2481_v12, %v1366_v49  ;;  %v1371_v61 = vmul.f32 %v2541_v38, %v1366_v49  ;;  %v1369_v10 = vmul.f32 %v2513_v28, %v1366_v49  ;;  %v1368_v17 = vmul.f32 %v2824_v25, %v1366_v49 }
 0x348   : > { %1318 = vrot.lane.b32.xlu2 %v1307_v4, %s1856_s30  ;;  %1316 = vrot.lane.b32.xlu0 %v1306_v3, %s1856_s30 }
 0x349   : > { %1380 = vrot.lane.b32.xlu1 %v1370_v41, %s1857_s5 }
 0x350   : > { %1312 = vrot.lane.b32.xlu2 %v1304_v59, %s1856_s30  ;;  %1382 = vrot.lane.b32.xlu0 %v1371_v61, %s1857_s5 }
 0x351   : > { %1314 = vrot.lane.b32.xlu1 %v1305_v58, %s1856_s30 }
 0x358   : > { %1378 = vrot.lane.b32.xlu2 %v1369_v10, %s1857_s5  ;;  %1376 = vrot.lane.b32.xlu0 %v1368_v17, %s1857_s5 }
 0x3a2   : > { %v1319_v0 = vpop.permute.xlu2 %1318 }
 0x3a3   : > { %v1327_v35 = vadd.f32 %v2541_v38, %v1319_v0 }
 0x3aa   : > { %v1313_v19 = vpop.permute.xlu2 %1312 }
 0x3b2   : > { %v1379_v54 = vpop.permute.xlu2 %1378 }
 0x3ba   : > { %v1317_v44 = vpop.permute.xlu0 %1316 }
 0x3bb   : > { %v1326_v23 = vadd.f32 %v2481_v12, %v1317_v44  ;;  %v1381_v53 = vpop.permute.xlu1 %1380  ;;  %v1324_v12 = vadd.f32 %v2824_v25, %v1313_v19 }
 0x3bd   : > { %v1390_v13 = vadd.f32 %v1381_v53, %v1326_v23 }
 0x3bf   : > { %v1652_v16 = vmul.f32 -1.442695, %v1390_v13 }
 0x3c1   : > { %1803 = vpow2.f32 %v1652_v16 }
 0x3c2   : > { %v1383_v5 = vpop.permute.xlu0 %1382 }
 0x3c3   : > { %v1391_v1 = vadd.f32 %v1383_v5, %v1327_v35  ;;  %v1315_v9 = vpop.permute.xlu1 %1314 }
 0x3c4   : > { %v1325_v50 = vadd.f32 %v2513_v28, %v1315_v9 }
 0x3c5   : > { %v1653_v31 = vmul.f32 -1.442695, %v1391_v1 }
 0x3c6   : > { %v1389_v52 = vadd.f32 %v1379_v54, %v1325_v50 }
 0x3c7   : > { %v1804_v56 = vpop.eup %1803  ;;  %1805 = vpow2.f32 %v1653_v31  ;;  %v1859_v31 = vmov 2  }
 0x3c8   : > { %v1406_v63 = vadd.f32 1.0, %v1804_v56  ;;  %v1651_v30 = vmul.f32 -1.442695, %v1389_v52 }
 0x3ca   : > { %1807 = vrcp.f32 %v1406_v63  ;;  %v1377_v14 = vpop.permute.xlu0 %1376  ;;  %v1449_v8 = vand.u32 2147483648, %v1406_v63  ;;  %v1447_v57 = vand.u32 2147483647, %v1406_v63  ;;  %vm1443_vm9 = vweird.f32 %v1406_v63 }
 0x3cb   : > { %1809 = vpow2.f32 %v1651_v30  ;;  %v1388_v48 = vadd.f32 %v1377_v14, %v1324_v12 }
 0x3cc   : > { %v1450_v36 = vor.u32 1.1754944e-38, %v1449_v8  ;;  %vm1448_vm3 = vcmp.eq.f32.partialorder %v1447_v57, 8.507059e+37  ;;  %v1825_v8 = vld [vmem:[%s1919_s27 + $0x8] sm:$0xff] }
 0x3cd   : > { %v1806_v38 = vpop.eup %1805  ;;  %v1650_v42 = vmul.f32 -1.442695, %v1388_v48 }
 0x3ce   : > { %v1407_v34 = vadd.f32 1.0, %v1806_v38 }
 0x3cf   : > { %1811 = vpow2.f32 %v1650_v42 }
 0x3d0   : > { %v1808_v21 = vpop.eup %1807  ;;  %1813 = vrcp.f32 %v1407_v34  ;;  %v1462_v7 = vand.u32 2147483647, %v1407_v34  ;;  %v1464_v40 = vand.u32 2147483648, %v1407_v34  ;;  %vm1458_vm7 = vweird.f32 %v1407_v34 }
 0x3d1   : > { %v1810_v28 = vpop.eup %1809  ;;  %v1439_v39 = vmul.f32 %v1808_v21, %v1406_v63  ;;  %vm1444_vm8 = vweird.f32 %v1808_v21 }
 0x3d2   : > { %v1405_v6 = vadd.f32 1.0, %v1810_v28  ;;  %vm1445_vm2 = vmor %vm1443_vm9, %vm1444_vm8  ;;  %vm1463_vm11 = vcmp.eq.f32.partialorder %v1462_v7, 8.507059e+37  ;;  %v1465_v59 = vor.u32 1.1754944e-38, %v1464_v40  ;;  %vm1505_vm8 = vcmask 261120  }
 0x3d3   : > { %v1440_v51 = vsub.f32 1.0, %v1439_v39 }
 0x3d4   : > { %1815 = vrcp.f32 %v1405_v6  ;;  %v1432_v61 = vand.u32 2147483647, %v1405_v6  ;;  %v1434_v58 = vand.u32 2147483648, %v1405_v6  ;;  %vm1428_vm13 = vweird.f32 %v1405_v6 }
 0x3d5   : > { %v1812_v55 = vpop.eup %1811  ;;  %v1441_v27 = vmul.f32 %v1808_v21, %v1440_v51 }
 0x3d6   : > { %v1814_v47 = vpop.eup %1813  ;;  %v1404_v62 = vadd.f32 1.0, %v1812_v55  ;;  %vm1433_vm15 = vcmp.eq.f32.partialorder %v1432_v61, 8.507059e+37  ;;  %v1435_v23 = vor.u32 1.1754944e-38, %v1434_v58 }
 0x3d7   : > { %v1442_v60 = vadd.f32 %v1808_v21, %v1441_v27  ;;  %v1454_v2 = vmul.f32 %v1814_v47, %v1407_v34  ;;  %vm1459_vm5 = vweird.f32 %v1814_v47 }
 0x3d8   : > { %1817 = vrcp.f32 %v1404_v62  ;;  %vm1460_vm10 = vmor %vm1458_vm7, %vm1459_vm5  ;;  %v1419_v53 = vand.u32 2147483648, %v1404_v62  ;;  %v1417_v35 = vand.u32 2147483647, %v1404_v62  ;;  %vm1413_vm1 = vweird.f32 %v1404_v62 }
 0x3d9   : > { %v1446_v29 = vsel %vm1445_vm2, %v1808_v21, %v1442_v60  ;;  %v1455_v18 = vsub.f32 1.0, %v1454_v2 }
 0x3da   : > { %v1816_v22 = vpop.eup %1815  ;;  %v1451_v33 = vsel %vm1448_vm3, %v1450_v36, %v1446_v29  ;;  %v1420_v9 = vor.u32 1.1754944e-38, %v1419_v53  ;;  %vm1418_vm6 = vcmp.eq.f32.partialorder %v1417_v35, 8.507059e+37 }
 0x3db   : > { %1480 = vperm.xlu1 %1726, %v1451_v33   ;;  %v1456_v46 = vmul.f32 %v1814_v47, %v1455_v18  ;;  %v1424_v49 = vmul.f32 %v1816_v22, %v1405_v6  ;;  %vm1429_vm12 = vweird.f32 %v1816_v22  ;;  %v1824_v6 = vld [vmem:[%s1919_s27] sm:$0xff] }
 0x3dc   : > { %vm1430_vm14 = vmor %vm1428_vm13, %vm1429_vm12 }
 0x3dd   : > { %v1457_v4 = vadd.f32 %v1814_v47, %v1456_v46  ;;  %v1425_v3 = vsub.f32 1.0, %v1424_v49 }
 0x3de   : > { %v1818_v41 = vpop.eup %1817 }
 0x3df   : > { %v1461_v10 = vsel %vm1460_vm10, %v1814_v47, %v1457_v4  ;;  %v1426_v17 = vmul.f32 %v1816_v22, %v1425_v3  ;;  %v1409_v0 = vmul.f32 %v1818_v41, %v1404_v62  ;;  %vm1414_vm0 = vweird.f32 %v1818_v41 }
 0x3e0   : > { %v1466_v15 = vsel %vm1463_vm11, %v1465_v59, %v1461_v10  ;;  %vm1415_vm4 = vmor %vm1413_vm1, %vm1414_vm0 }
 0x3e1   : > { %1485 = vperm.xlu0 %1727, %v1466_v15   ;;  %v1427_v44 = vadd.f32 %v1816_v22, %v1426_v17  ;;  %v1410_v19 = vsub.f32 1.0, %v1409_v0 }
 0x3e3   : > { %v1431_v13 = vsel %vm1430_vm14, %v1816_v22, %v1427_v44  ;;  %v1411_v16 = vmul.f32 %v1818_v41, %v1410_v19 }
 0x3e4   : > { %v1436_v5 = vsel %vm1433_vm15, %v1435_v23, %v1431_v13 }
 0x3e5   : > { %1475 = vperm.xlu1 %1726, %v1436_v5   ;;  %v1412_v1 = vadd.f32 %v1818_v41, %v1411_v16 }
 0x3e7   : > { %v1416_v50 = vsel %vm1415_vm4, %v1818_v41, %v1412_v1 }
 0x3e8   : > { %v1421_v54 = vsel %vm1418_vm6, %v1420_v9, %v1416_v50 }
 0x3e9   : > { %1470 = vperm.xlu2 %1728, %v1421_v54   ;;  %1730 = vset.pattern.permute.xlu0 %v1859_v31 }
 0x3f1   : > { %1729 = vset.pattern.permute.xlu2 %v1859_v31 }
 0x3f2   : > { %1502 = vperm.xlu2 %1729, %v2824_v25  }
 0x443   : > { %v1471_v63 = vpop.permute.xlu2 %1470 }
 0x444   : > { %v1488_v34 = vmul.f32 %v1471_v63, %v2688_v11  ;;  %v1489_v28 = vmul.f32 %v1471_v63, %v2693_v20  ;;  %v1496_v11 = vld [vmem:[%s2859_s2] sm:$0xf] }
 0x44c   : > { %v1503_v20 = vpop.permute.xlu2 %1502 }
 0x44d   : > { %v1481_v52 = vpop.permute.xlu1 %1480 }
 0x44e   : > { %v1492_v30 = vmul.f32 %v1481_v52, %v2782_v37  ;;  %v1493_v12 = vmul.f32 %v1481_v52, %v2787_v43 }
 0x453   : > { %v1486_v56 = vpop.permute.xlu0 %1485 }
 0x454   : > { %v1494_v14 = vmul.f32 %v1486_v56, %v2798_v45  ;;  %v1495_v48 = vmul.f32 %v1486_v56, %v2801_v26 }
 0x456   : > { %v1499_v38 = vpack.c.bf16 %v1494_v14, %v1492_v30  ;;  %v1500_v42 = vpack.c.bf16 %v1495_v48, %v1493_v12 }
 0x457   : > { %v1476_v21 = vpop.permute.xlu1 %1475 }
 0x458   : > { %v1490_v25 = vmul.f32 %v1476_v21, %v2769_v32  ;;  %v1491_v39 = vmul.f32 %v1476_v21, %v2774_v24  ;;  %1515 = vmatpush.bf16.msra.mxu2 %v1499_v38  ;;  %1528 = vmatpush.bf16.msra.mxu3 %v1500_v42 }
 0x45a   : > { %v1497_v37 = vpack.c.bf16 %v1490_v25, %v1488_v34  ;;  %v1498_v43 = vpack.c.bf16 %v1491_v39, %v1489_v28 }
 0x45c   : > { %1516 = vmatpush.bf16.msra.mxu2 %v1497_v37  ;;  %1529 = vmatpush.bf16.msra.mxu3 %v1498_v43 }
 0x45f   : > { %1654 = vmatmul.msk.bf16.vlgmr.msra.gmra.mxu2 %vm1505_vm8, %v1496_v11  ;;  %1655 = vmatmul.msk.bf16.vlgmr.msra.gmra.mxu3 %vm1505_vm8, %v1496_v11 }
 0x4e2   : > { %v1518_v32 = vpop.f32.mrf.mxu2  ;;  %v1531_v45 = vpop.f32.mrf.mxu3 }
 0x4e3   : > { %v1519_v24 = vadd.f32 %v1518_v32, %v1503_v20  ;;  %v1532_v26 = vadd.f32 %v1531_v45, %v1503_v20 }
 0x4e5   : > { %v1535_v51 = vadd.f32 %v1824_v6, %v1519_v24  ;;  %v1536_v55 = vadd.f32 %v1825_v8, %v1532_v26 }
 0x4e7   : > { %1537 = vst [vmem:[%s199_s12] sm:$0xff] %v1535_v51 }
 0x4e8   : > { %1538 = vst [vmem:[%s199_s12 + $0x8] sm:$0xff] %v1536_v55 }
 0x4ea   : > { %v1520_v27 = vpop.f32.mrf.mxu2  ;;  %v1533_v57 = vpop.f32.mrf.mxu3 }
 0x4eb PF: > { %s14_s15 = sadd.s32 1, %s1832_s15  }
 0x4ec   : > { %p11_p4 = scmp.ge.s32.totalorder %s14_s15, 4  }
 0x4ee   :  { %13 = sbr.rel (!%p11_p4) target bundleno = 1 (0x1), region = 66 }

</bundles_post_ra>
